<compile_context>
chip_gen: v7x
topology: tpu7x:2x2x1
jax: 0.10.0
libtpu: 0.0.40
codegen_flags: <defaults>
</compile_context>

<pallas_src>
import jax
import jax.numpy as jnp
from jax import lax
from jax.experimental import pallas as pl
from jax.experimental.pallas import tpu as pltpu

# ---- problem sizes (small, consistent with the module) ----
B = 2           # batch
CH = 4          # channels
DYN = 8         # dynamic_channels
GROUPS = 2      # groups
H = W = 16      # spatial
HW = H * W      # 256 -> lane-dense trailing dim (2 x 128 lanes)
REP = 32        # representation dim (fixed to 32 in the module)
KS = 3          # dynamic conv kernel size
FPG = CH // GROUPS      # input feature channels per group
OPG = DYN // GROUPS     # dynamic output channels per group
EPS = 1e-5              # torch InstanceNorm2d default eps

# packed-parameter row offsets (all slices land tile-aligned / within one
# 8-row sublane tile, so no in-kernel relayouts are needed)
_K_OFF = 0                        # 0:72   dynamic 3x3 weights, rows t*DYN + d
_G1_OFF = DYN * KS * KS           # 72:80  gamma1 projection
_B1_OFF = _G1_OFF + DYN           # 80:88  beta1 projection
_G2_OFF = _B1_OFF + DYN           # 88:92  gamma2 projection
_B2_OFF = _G2_OFF + CH            # 92:96  beta2 projection
_CA_OFF = _B2_OFF + CH            # 96:104 CA hidden projection
_PROJ_ROWS = _CA_OFF + DYN        # 104
_AUX_ROW = _PROJ_ROWS             # 104:108  [w2 | wca2 | prelu_a]
_PACK_ROWS = _PROJ_ROWS + CH      # 108


def _resblock_kernel(par_ref, rept_ref, taps_ref, res_ref, out_ref):
    # par_ref  : (108, 32)  packed static params
    # rept_ref : (32, B)    degradation representation, transposed
    # taps_ref : (B*G*9, HW) group-summed 3x3 taps, row = (b*G + g)*9 + t
    # res_ref  : (B*CH, HW) residual (original x), lane-dense
    # out_ref  : (B*CH, HW)

    w_all = par_ref[0:_PROJ_ROWS, :]                        # (104, 32)
    w2 = par_ref[_AUX_ROW:_AUX_ROW + CH, 0:DYN]             # (4, 8)
    wca2 = par_ref[_AUX_ROW:_AUX_ROW + CH, DYN:2 * DYN]     # (4, 8)
    prelu_a = par_ref[_AUX_ROW:_AUX_ROW + 1, 2 * DYN:2 * DYN + 1]  # (1, 1)

    # Fused weight generation: ONE MXU dot.  Per-sample conditioning values
    # land on the sublane axis -> column slices give per-row coefficients
    # directly, no transposes / relayouts.
    proj = jnp.dot(w_all, rept_ref[...],
                   preferred_element_type=jnp.float32)      # (104, B)
    act = jnp.where(proj > 0, proj, 0.1 * proj)              # LeakyReLU(0.1)

    # CA_layer attention: 1x1 -> PReLU -> 1x1 -> sigmoid, both samples at once.
    h = proj[_CA_OFF:_CA_OFF + DYN, :]                       # (8, B) (pre-activation)
    h = jnp.maximum(h, 0.0) + prelu_a * jnp.minimum(h, 0.0)  # PReLU (scalar a)
    att = jax.nn.sigmoid(jnp.dot(wca2, h,
                                 preferred_element_type=jnp.float32))  # (CH, B)

    for b in range(B):                                       # B=2, unrolled
        # --- dynamic grouped 3x3 conv: 9 broadcast-FMAs per group (VPU) ---
        group_outs = []
        for g in range(GROUPS):
            row0 = (b * GROUPS + g) * KS * KS
            acc = None
            for t in range(KS * KS):
                coef = act[t * DYN + g * OPG:t * DYN + (g + 1) * OPG, b:b + 1]  # (OPG,1)
                tap = taps_ref[row0 + t:row0 + t + 1, :]                        # (1,HW)
                term = coef * tap                                               # (OPG,HW)
                acc = term if acc is None else acc + term
            group_outs.append(acc)
        o1 = jnp.concatenate(group_outs, axis=0)             # (DYN, HW)

        # InstanceNorm2d #1 (affine=False, biased var) — fused single pass.
        m1 = jnp.mean(o1, axis=-1, keepdims=True)
        v1 = jnp.maximum(jnp.mean(o1 * o1, axis=-1, keepdims=True) - m1 * m1, 0.0)
        o1 = (o1 - m1) * lax.rsqrt(v1 + EPS)

        # condition_modulate #1 + ReLU
        o1 = jnp.maximum(o1 * act[_G1_OFF:_G1_OFF + DYN, b:b + 1]
                         + act[_B1_OFF:_B1_OFF + DYN, b:b + 1], 0.0)

        # ConvLayer: 1x1 conv DYN -> CH (reflection pad of 0 is a no-op).
        # Bias intentionally omitted: a per-channel constant is exactly
        # cancelled by InstanceNorm #2's mean subtraction.
        o2 = jnp.dot(w2, o1, preferred_element_type=jnp.float32)   # (CH, HW)

        # InstanceNorm2d #2 — fused single pass.
        m2 = jnp.mean(o2, axis=-1, keepdims=True)
        v2 = jnp.maximum(jnp.mean(o2 * o2, axis=-1, keepdims=True) - m2 * m2, 0.0)
        o2 = (o2 - m2) * lax.rsqrt(v2 + EPS)

        # condition_modulate #2
        o2 = o2 * act[_G2_OFF:_G2_OFF + CH, b:b + 1] + act[_B2_OFF:_B2_OFF + CH, b:b + 1]

        # CA_layer residual: out + residual * att
        out_ref[b * CH:(b + 1) * CH, :] = (
            o2 + res_ref[b * CH:(b + 1) * CH, :] * att[:, b:b + 1])


def prepare_params(p):
    """One-time packing of the static module params into ONE VMEM operand.

    wk is re-ordered tap-major (row = t*DYN + d) so that the in-kernel
    per-(group, tap) coefficient slices stay within a single 8-row tile.
    The conv2 bias is deliberately not packed (dead compute, see kernel)."""
    wk_t = p['wk'].reshape(DYN, KS * KS, REP).transpose(1, 0, 2).reshape(
        DYN * KS * KS, REP)
    w_all = jnp.concatenate(
        [wk_t, p['wg1'], p['wb1'], p['wg2'], p['wb2'], p['wca1']], axis=0)
    packed = jnp.zeros((_PACK_ROWS, REP), jnp.float32)
    packed = packed.at[0:_PROJ_ROWS, :].set(w_all)
    packed = packed.at[_AUX_ROW:_AUX_ROW + CH, 0:DYN].set(p['w2'])
    packed = packed.at[_AUX_ROW:_AUX_ROW + CH, DYN:2 * DYN].set(p['wca2'])
    packed = packed.at[_AUX_ROW, 2 * DYN].set(p['prelu_a'])
    return packed


def residual_block_pallas(x, rep, packed):
    # x-dependent plumbing, kept to a handful of XLA ops:
    #  reflect pad + ONE small conv (constant one-hot kernel) that does the
    #  per-group channel sum AND the 3x3 patch extraction in a single fused op.
    xpad = jnp.pad(x, ((0, 0), (0, 0), (1, 1), (1, 1)), mode='reflect')
    eye9 = jnp.eye(KS * KS, dtype=jnp.float32).reshape(KS * KS, 1, KS, KS)
    patch_w = jnp.tile(eye9, (GROUPS, FPG, 1, 1))           # (G*9, FPG, 3, 3)
    taps = lax.conv_general_dilated(
        xpad, patch_w, window_strides=(1, 1), padding='VALID',
        dimension_numbers=('NCHW', 'OIHW', 'NCHW'),
        feature_group_count=GROUPS).reshape(B * GROUPS * KS * KS, HW)  # (36, HW)

    res2d = x.reshape(B * CH, HW)
    rep_t = rep.T                                            # (REP, B)

    vmem = pl.BlockSpec(memory_space=pltpu.MemorySpace.VMEM)
    out2d = pl.pallas_call(
        _resblock_kernel,
        out_shape=jax.ShapeDtypeStruct((B * CH, HW), jnp.float32),
        in_specs=[vmem, vmem, vmem, vmem],
        out_specs=vmem,
    )(packed, rep_t, taps, res2d)
    return out2d.reshape(B, CH, H, W)


# ------------------------- pure-JAX reference -------------------------
def _leaky(v):          # LeakyReLU(0.1)
    return jnp.where(v > 0, v, 0.1 * v)


def residual_block_ref(x, rep, p):
    xpad = jnp.pad(x, ((0, 0), (0, 0), (1, 1), (1, 1)), mode='reflect')
    hp, wp = H + 2, W + 2

    # Dynamic_ConvLayer2 (mirrors torch code exactly)
    kflat = _leaky(rep @ p['wk'].T)
    k = kflat.reshape(B, DYN, 1, KS, KS)
    krep = jnp.repeat(k, FPG, axis=2)                        # repeat_interleave
    out = lax.conv_general_dilated(
        xpad.reshape(1, B * CH, hp, wp),
        krep.reshape(B * DYN, FPG, KS, KS),
        window_strides=(1, 1), padding='VALID',
        dimension_numbers=('NCHW', 'OIHW', 'NCHW'),
        feature_group_count=B * GROUPS).reshape(B, DYN, H, W)

    def inorm(t):
        m = t.mean(axis=(2, 3), keepdims=True)
        v = ((t - m) ** 2).mean(axis=(2, 3), keepdims=True)
        return (t - m) / jnp.sqrt(v + EPS)

    out = inorm(out)
    g1 = _leaky(rep @ p['wg1'].T)[:, :, None, None]
    b1 = _leaky(rep @ p['wb1'].T)[:, :, None, None]
    out = jnp.maximum(out * g1 + b1, 0.0)
    out = jnp.einsum('od,bdhw->bohw', p['w2'], out) + p['b2'][None, :, None, None]
    out = inorm(out)
    g2 = _leaky(rep @ p['wg2'].T)[:, :, None, None]
    b2 = _leaky(rep @ p['wb2'].T)[:, :, None, None]
    out = out * g2 + b2
    h = rep @ p['wca1'].T
    h = jnp.maximum(h, 0.0) + p['prelu_a'] * jnp.minimum(h, 0.0)
    att = jax.nn.sigmoid(h @ p['wca2'].T)[:, :, None, None]
    return out + x * att


if __name__ == "__main__":
    key = jax.random.PRNGKey(0)
    ks = jax.random.split(key, 11)
    sc = 0.2
    params = {
        'wk':   jax.random.normal(ks[0], (DYN * KS * KS, REP), jnp.float32) * sc,
        'wg1':  jax.random.normal(ks[1], (DYN, REP), jnp.float32) * sc,
        'wb1':  jax.random.normal(ks[2], (DYN, REP), jnp.float32) * sc,
        'w2':   jax.random.normal(ks[3], (CH, DYN), jnp.float32) * sc,
        'b2':   jax.random.normal(ks[4], (CH,), jnp.float32) * sc,
        'wg2':  jax.random.normal(ks[5], (CH, REP), jnp.float32) * sc,
        'wb2':  jax.random.normal(ks[6], (CH, REP), jnp.float32) * sc,
        'wca1': jax.random.normal(ks[7], (REP // 4, REP), jnp.float32) * sc,
        'wca2': jax.random.normal(ks[8], (CH, REP // 4), jnp.float32) * sc,
        'prelu_a': jnp.float32(0.25),
    }
    x = jax.random.normal(ks[9], (B, CH, H, W), jnp.float32)
    representation = jax.random.normal(ks[10], (B, REP), jnp.float32)

    packed = prepare_params(params)                # one-time param packing
    out = jax.block_until_ready(
        jax.jit(residual_block_pallas)(x, representation, packed))
    ref = residual_block_ref(x, representation, params)

    assert out.shape == (B, CH, H, W)
    err = float(jnp.max(jnp.abs(out - ref)))
    assert err < 1e-3, f"max abs err {err}"
    print("KERNEL_OK")
</pallas_src>

<mosaic_0001>
module attributes {stable_mosaic.version = 11 : i64} {
  func.func @_resblock_kernel(%arg0: memref<108x32xf32, #tpu.memory_space<vmem>>, %arg1: memref<32x2xf32, #tpu.memory_space<vmem>>, %arg2: memref<36x256xf32, #tpu.memory_space<vmem>>, %arg3: memref<8x256xf32, #tpu.memory_space<vmem>>, %arg4: memref<8x256xf32, #tpu.memory_space<vmem>>) attributes {dimension_semantics = [], scalar_prefetch = 0 : i64, scratch_operands = 0 : i64, tpu.core_type = #tpu.core_type<tc>} {
    %c0 = arith.constant 0 : index
    %c0_0 = arith.constant 0 : index
    %0 = vector.load %arg0[%c0, %c0_0] : memref<108x32xf32, #tpu.memory_space<vmem>>, vector<104x32xf32>
    %c104 = arith.constant 104 : index
    %c0_1 = arith.constant 0 : index
    %1 = vector.load %arg0[%c104, %c0_1] : memref<108x32xf32, #tpu.memory_space<vmem>>, vector<4x8xf32>
    %c104_2 = arith.constant 104 : index
    %c8 = arith.constant 8 : index
    %2 = vector.load %arg0[%c104_2, %c8] : memref<108x32xf32, #tpu.memory_space<vmem>>, vector<4x8xf32>
    %c104_3 = arith.constant 104 : index
    %c16 = arith.constant 16 : index
    %3 = vector.load %arg0[%c104_3, %c16] : memref<108x32xf32, #tpu.memory_space<vmem>>, vector<1x1xf32>
    %c0_4 = arith.constant 0 : index
    %c0_5 = arith.constant 0 : index
    %4 = vector.load %arg1[%c0_4, %c0_5] : memref<32x2xf32, #tpu.memory_space<vmem>>, vector<32x2xf32>
    %cst = arith.constant dense<0.000000e+00> : vector<104x2xf32>
    %5 = tpu.matmul %0, %4, %cst {dimension_numbers = #tpu.dot_dimension_numbers<[1], [0], [0], [1], [0, 0, 1, 1], [], []>} : vector<104x32xf32>, vector<32x2xf32>, vector<104x2xf32> -> vector<104x2xf32>
    %cst_6 = arith.constant 0.000000e+00 : f32
    %6 = vector.broadcast %cst_6 : f32 to vector<104x2xf32>
    %7 = arith.cmpf ogt, %5, %6 : vector<104x2xf32>
    %cst_7 = arith.constant 1.000000e-01 : f32
    %8 = vector.broadcast %cst_7 : f32 to vector<104x2xf32>
    %9 = arith.mulf %8, %5 : vector<104x2xf32>
    %10 = arith.select %7, %5, %9 : vector<104x2xi1>, vector<104x2xf32>
    %11 = vector.extract_strided_slice %5 {offsets = [96, 0], sizes = [8, 2], strides = [1, 1]} : vector<104x2xf32> to vector<8x2xf32>
    %cst_8 = arith.constant 0.000000e+00 : f32
    %12 = vector.broadcast %cst_8 : f32 to vector<8x2xf32>
    %13 = arith.maximumf %11, %12 : vector<8x2xf32>
    %cst_9 = arith.constant 0.000000e+00 : f32
    %14 = vector.broadcast %cst_9 : f32 to vector<8x2xf32>
    %15 = arith.minimumf %11, %14 : vector<8x2xf32>
    %16 = vector.broadcast %3 : vector<1x1xf32> to vector<8x2xf32>
    %17 = arith.mulf %16, %15 : vector<8x2xf32>
    %18 = arith.addf %13, %17 : vector<8x2xf32>
    %cst_10 = arith.constant dense<0.000000e+00> : vector<4x2xf32>
    %19 = tpu.matmul %2, %18, %cst_10 {dimension_numbers = #tpu.dot_dimension_numbers<[1], [0], [0], [1], [0, 0, 1, 1], [], []>} : vector<4x8xf32>, vector<8x2xf32>, vector<4x2xf32> -> vector<4x2xf32>
    %20 = arith.negf %19 : vector<4x2xf32>
    %21 = math.exp %20 : vector<4x2xf32>
    %cst_11 = arith.constant 1.000000e+00 : f32
    %22 = vector.broadcast %cst_11 : f32 to vector<4x2xf32>
    %23 = arith.addf %22, %21 : vector<4x2xf32>
    %24 = arith.divf %22, %23 : vector<4x2xf32>
    %25 = vector.extract_strided_slice %10 {offsets = [0, 0], sizes = [4, 1], strides = [1, 1]} : vector<104x2xf32> to vector<4x1xf32>
    %c0_12 = arith.constant 0 : index
    %c0_13 = arith.constant 0 : index
    %26 = vector.load %arg2[%c0_12, %c0_13] : memref<36x256xf32, #tpu.memory_space<vmem>>, vector<1x256xf32>
    %27 = vector.broadcast %25 : vector<4x1xf32> to vector<4x256xf32>
    %28 = vector.broadcast %26 : vector<1x256xf32> to vector<4x256xf32>
    %29 = arith.mulf %27, %28 : vector<4x256xf32>
    %30 = vector.extract_strided_slice %10 {offsets = [8, 0], sizes = [4, 1], strides = [1, 1]} : vector<104x2xf32> to vector<4x1xf32>
    %c1 = arith.constant 1 : index
    %c0_14 = arith.constant 0 : index
    %31 = vector.load %arg2[%c1, %c0_14] : memref<36x256xf32, #tpu.memory_space<vmem>>, vector<1x256xf32>
    %32 = vector.broadcast %30 : vector<4x1xf32> to vector<4x256xf32>
    %33 = vector.broadcast %31 : vector<1x256xf32> to vector<4x256xf32>
    %34 = arith.mulf %32, %33 : vector<4x256xf32>
    %35 = arith.addf %29, %34 : vector<4x256xf32>
    %36 = vector.extract_strided_slice %10 {offsets = [16, 0], sizes = [4, 1], strides = [1, 1]} : vector<104x2xf32> to vector<4x1xf32>
    %c2 = arith.constant 2 : index
    %c0_15 = arith.constant 0 : index
    %37 = vector.load %arg2[%c2, %c0_15] : memref<36x256xf32, #tpu.memory_space<vmem>>, vector<1x256xf32>
    %38 = vector.broadcast %36 : vector<4x1xf32> to vector<4x256xf32>
    %39 = vector.broadcast %37 : vector<1x256xf32> to vector<4x256xf32>
    %40 = arith.mulf %38, %39 : vector<4x256xf32>
    %41 = arith.addf %35, %40 : vector<4x256xf32>
    %42 = vector.extract_strided_slice %10 {offsets = [24, 0], sizes = [4, 1], strides = [1, 1]} : vector<104x2xf32> to vector<4x1xf32>
    %c3 = arith.constant 3 : index
    %c0_16 = arith.constant 0 : index
    %43 = vector.load %arg2[%c3, %c0_16] : memref<36x256xf32, #tpu.memory_space<vmem>>, vector<1x256xf32>
    %44 = vector.broadcast %42 : vector<4x1xf32> to vector<4x256xf32>
    %45 = vector.broadcast %43 : vector<1x256xf32> to vector<4x256xf32>
    %46 = arith.mulf %44, %45 : vector<4x256xf32>
    %47 = arith.addf %41, %46 : vector<4x256xf32>
    %48 = vector.extract_strided_slice %10 {offsets = [32, 0], sizes = [4, 1], strides = [1, 1]} : vector<104x2xf32> to vector<4x1xf32>
    %c4 = arith.constant 4 : index
    %c0_17 = arith.constant 0 : index
    %49 = vector.load %arg2[%c4, %c0_17] : memref<36x256xf32, #tpu.memory_space<vmem>>, vector<1x256xf32>
    %50 = vector.broadcast %48 : vector<4x1xf32> to vector<4x256xf32>
    %51 = vector.broadcast %49 : vector<1x256xf32> to vector<4x256xf32>
    %52 = arith.mulf %50, %51 : vector<4x256xf32>
    %53 = arith.addf %47, %52 : vector<4x256xf32>
    %54 = vector.extract_strided_slice %10 {offsets = [40, 0], sizes = [4, 1], strides = [1, 1]} : vector<104x2xf32> to vector<4x1xf32>
    %c5 = arith.constant 5 : index
    %c0_18 = arith.constant 0 : index
    %55 = vector.load %arg2[%c5, %c0_18] : memref<36x256xf32, #tpu.memory_space<vmem>>, vector<1x256xf32>
    %56 = vector.broadcast %54 : vector<4x1xf32> to vector<4x256xf32>
    %57 = vector.broadcast %55 : vector<1x256xf32> to vector<4x256xf32>
    %58 = arith.mulf %56, %57 : vector<4x256xf32>
    %59 = arith.addf %53, %58 : vector<4x256xf32>
    %60 = vector.extract_strided_slice %10 {offsets = [48, 0], sizes = [4, 1], strides = [1, 1]} : vector<104x2xf32> to vector<4x1xf32>
    %c6 = arith.constant 6 : index
    %c0_19 = arith.constant 0 : index
    %61 = vector.load %arg2[%c6, %c0_19] : memref<36x256xf32, #tpu.memory_space<vmem>>, vector<1x256xf32>
    %62 = vector.broadcast %60 : vector<4x1xf32> to vector<4x256xf32>
    %63 = vector.broadcast %61 : vector<1x256xf32> to vector<4x256xf32>
    %64 = arith.mulf %62, %63 : vector<4x256xf32>
    %65 = arith.addf %59, %64 : vector<4x256xf32>
    %66 = vector.extract_strided_slice %10 {offsets = [56, 0], sizes = [4, 1], strides = [1, 1]} : vector<104x2xf32> to vector<4x1xf32>
    %c7 = arith.constant 7 : index
    %c0_20 = arith.constant 0 : index
    %67 = vector.load %arg2[%c7, %c0_20] : memref<36x256xf32, #tpu.memory_space<vmem>>, vector<1x256xf32>
    %68 = vector.broadcast %66 : vector<4x1xf32> to vector<4x256xf32>
    %69 = vector.broadcast %67 : vector<1x256xf32> to vector<4x256xf32>
    %70 = arith.mulf %68, %69 : vector<4x256xf32>
    %71 = arith.addf %65, %70 : vector<4x256xf32>
    %72 = vector.extract_strided_slice %10 {offsets = [64, 0], sizes = [4, 1], strides = [1, 1]} : vector<104x2xf32> to vector<4x1xf32>
    %c8_21 = arith.constant 8 : index
    %c0_22 = arith.constant 0 : index
    %73 = vector.load %arg2[%c8_21, %c0_22] : memref<36x256xf32, #tpu.memory_space<vmem>>, vector<1x256xf32>
    %74 = vector.broadcast %72 : vector<4x1xf32> to vector<4x256xf32>
    %75 = vector.broadcast %73 : vector<1x256xf32> to vector<4x256xf32>
    %76 = arith.mulf %74, %75 : vector<4x256xf32>
    %77 = arith.addf %71, %76 : vector<4x256xf32>
    %78 = vector.extract_strided_slice %10 {offsets = [4, 0], sizes = [4, 1], strides = [1, 1]} : vector<104x2xf32> to vector<4x1xf32>
    %c9 = arith.constant 9 : index
    %c0_23 = arith.constant 0 : index
    %79 = vector.load %arg2[%c9, %c0_23] : memref<36x256xf32, #tpu.memory_space<vmem>>, vector<1x256xf32>
    %80 = vector.broadcast %78 : vector<4x1xf32> to vector<4x256xf32>
    %81 = vector.broadcast %79 : vector<1x256xf32> to vector<4x256xf32>
    %82 = arith.mulf %80, %81 : vector<4x256xf32>
    %83 = vector.extract_strided_slice %10 {offsets = [12, 0], sizes = [4, 1], strides = [1, 1]} : vector<104x2xf32> to vector<4x1xf32>
    %c10 = arith.constant 10 : index
    %c0_24 = arith.constant 0 : index
    %84 = vector.load %arg2[%c10, %c0_24] : memref<36x256xf32, #tpu.memory_space<vmem>>, vector<1x256xf32>
    %85 = vector.broadcast %83 : vector<4x1xf32> to vector<4x256xf32>
    %86 = vector.broadcast %84 : vector<1x256xf32> to vector<4x256xf32>
    %87 = arith.mulf %85, %86 : vector<4x256xf32>
    %88 = arith.addf %82, %87 : vector<4x256xf32>
    %89 = vector.extract_strided_slice %10 {offsets = [20, 0], sizes = [4, 1], strides = [1, 1]} : vector<104x2xf32> to vector<4x1xf32>
    %c11 = arith.constant 11 : index
    %c0_25 = arith.constant 0 : index
    %90 = vector.load %arg2[%c11, %c0_25] : memref<36x256xf32, #tpu.memory_space<vmem>>, vector<1x256xf32>
    %91 = vector.broadcast %89 : vector<4x1xf32> to vector<4x256xf32>
    %92 = vector.broadcast %90 : vector<1x256xf32> to vector<4x256xf32>
    %93 = arith.mulf %91, %92 : vector<4x256xf32>
    %94 = arith.addf %88, %93 : vector<4x256xf32>
    %95 = vector.extract_strided_slice %10 {offsets = [28, 0], sizes = [4, 1], strides = [1, 1]} : vector<104x2xf32> to vector<4x1xf32>
    %c12 = arith.constant 12 : index
    %c0_26 = arith.constant 0 : index
    %96 = vector.load %arg2[%c12, %c0_26] : memref<36x256xf32, #tpu.memory_space<vmem>>, vector<1x256xf32>
    %97 = vector.broadcast %95 : vector<4x1xf32> to vector<4x256xf32>
    %98 = vector.broadcast %96 : vector<1x256xf32> to vector<4x256xf32>
    %99 = arith.mulf %97, %98 : vector<4x256xf32>
    %100 = arith.addf %94, %99 : vector<4x256xf32>
    %101 = vector.extract_strided_slice %10 {offsets = [36, 0], sizes = [4, 1], strides = [1, 1]} : vector<104x2xf32> to vector<4x1xf32>
    %c13 = arith.constant 13 : index
    %c0_27 = arith.constant 0 : index
    %102 = vector.load %arg2[%c13, %c0_27] : memref<36x256xf32, #tpu.memory_space<vmem>>, vector<1x256xf32>
    %103 = vector.broadcast %101 : vector<4x1xf32> to vector<4x256xf32>
    %104 = vector.broadcast %102 : vector<1x256xf32> to vector<4x256xf32>
    %105 = arith.mulf %103, %104 : vector<4x256xf32>
    %106 = arith.addf %100, %105 : vector<4x256xf32>
    %107 = vector.extract_strided_slice %10 {offsets = [44, 0], sizes = [4, 1], strides = [1, 1]} : vector<104x2xf32> to vector<4x1xf32>
    %c14 = arith.constant 14 : index
    %c0_28 = arith.constant 0 : index
    %108 = vector.load %arg2[%c14, %c0_28] : memref<36x256xf32, #tpu.memory_space<vmem>>, vector<1x256xf32>
    %109 = vector.broadcast %107 : vector<4x1xf32> to vector<4x256xf32>
    %110 = vector.broadcast %108 : vector<1x256xf32> to vector<4x256xf32>
    %111 = arith.mulf %109, %110 : vector<4x256xf32>
    %112 = arith.addf %106, %111 : vector<4x256xf32>
    %113 = vector.extract_strided_slice %10 {offsets = [52, 0], sizes = [4, 1], strides = [1, 1]} : vector<104x2xf32> to vector<4x1xf32>
    %c15 = arith.constant 15 : index
    %c0_29 = arith.constant 0 : index
    %114 = vector.load %arg2[%c15, %c0_29] : memref<36x256xf32, #tpu.memory_space<vmem>>, vector<1x256xf32>
    %115 = vector.broadcast %113 : vector<4x1xf32> to vector<4x256xf32>
    %116 = vector.broadcast %114 : vector<1x256xf32> to vector<4x256xf32>
    %117 = arith.mulf %115, %116 : vector<4x256xf32>
    %118 = arith.addf %112, %117 : vector<4x256xf32>
    %119 = vector.extract_strided_slice %10 {offsets = [60, 0], sizes = [4, 1], strides = [1, 1]} : vector<104x2xf32> to vector<4x1xf32>
    %c16_30 = arith.constant 16 : index
    %c0_31 = arith.constant 0 : index
    %120 = vector.load %arg2[%c16_30, %c0_31] : memref<36x256xf32, #tpu.memory_space<vmem>>, vector<1x256xf32>
    %121 = vector.broadcast %119 : vector<4x1xf32> to vector<4x256xf32>
    %122 = vector.broadcast %120 : vector<1x256xf32> to vector<4x256xf32>
    %123 = arith.mulf %121, %122 : vector<4x256xf32>
    %124 = arith.addf %118, %123 : vector<4x256xf32>
    %125 = vector.extract_strided_slice %10 {offsets = [68, 0], sizes = [4, 1], strides = [1, 1]} : vector<104x2xf32> to vector<4x1xf32>
    %c17 = arith.constant 17 : index
    %c0_32 = arith.constant 0 : index
    %126 = vector.load %arg2[%c17, %c0_32] : memref<36x256xf32, #tpu.memory_space<vmem>>, vector<1x256xf32>
    %127 = vector.broadcast %125 : vector<4x1xf32> to vector<4x256xf32>
    %128 = vector.broadcast %126 : vector<1x256xf32> to vector<4x256xf32>
    %129 = arith.mulf %127, %128 : vector<4x256xf32>
    %130 = arith.addf %124, %129 : vector<4x256xf32>
    %131 = tpu.concatenate %77, %130 in 0 : vector<4x256xf32>, vector<4x256xf32> -> vector<8x256xf32>
    %cst_33 = arith.constant dense<0.000000e+00> : vector<8xf32>
    %132 = vector.multi_reduction <add>, %131, %cst_33 [1] : vector<8x256xf32> to vector<8xf32>
    %133 = vector.shape_cast %132 : vector<8xf32> to vector<8x1xf32>
    %cst_34 = arith.constant 2.560000e+02 : f32
    %134 = vector.broadcast %cst_34 : f32 to vector<8x1xf32>
    %135 = arith.divf %133, %134 : vector<8x1xf32>
    %136 = arith.mulf %131, %131 : vector<8x256xf32>
    %cst_35 = arith.constant dense<0.000000e+00> : vector<8xf32>
    %137 = vector.multi_reduction <add>, %136, %cst_35 [1] : vector<8x256xf32> to vector<8xf32>
    %138 = vector.shape_cast %137 : vector<8xf32> to vector<8x1xf32>
    %cst_36 = arith.constant 2.560000e+02 : f32
    %139 = vector.broadcast %cst_36 : f32 to vector<8x1xf32>
    %140 = arith.divf %138, %139 : vector<8x1xf32>
    %141 = arith.mulf %135, %135 : vector<8x1xf32>
    %142 = arith.subf %140, %141 : vector<8x1xf32>
    %cst_37 = arith.constant 0.000000e+00 : f32
    %143 = vector.broadcast %cst_37 : f32 to vector<8x1xf32>
    %144 = arith.maximumf %142, %143 : vector<8x1xf32>
    %145 = vector.broadcast %135 : vector<8x1xf32> to vector<8x256xf32>
    %146 = arith.subf %131, %145 : vector<8x256xf32>
    %cst_38 = arith.constant 9.99999974E-6 : f32
    %147 = vector.broadcast %cst_38 : f32 to vector<8x1xf32>
    %148 = arith.addf %144, %147 : vector<8x1xf32>
    %149 = math.rsqrt %148 : vector<8x1xf32>
    %150 = vector.broadcast %149 : vector<8x1xf32> to vector<8x256xf32>
    %151 = arith.mulf %146, %150 : vector<8x256xf32>
    %152 = vector.extract_strided_slice %10 {offsets = [72, 0], sizes = [8, 1], strides = [1, 1]} : vector<104x2xf32> to vector<8x1xf32>
    %153 = vector.broadcast %152 : vector<8x1xf32> to vector<8x256xf32>
    %154 = arith.mulf %151, %153 : vector<8x256xf32>
    %155 = vector.extract_strided_slice %10 {offsets = [80, 0], sizes = [8, 1], strides = [1, 1]} : vector<104x2xf32> to vector<8x1xf32>
    %156 = vector.broadcast %155 : vector<8x1xf32> to vector<8x256xf32>
    %157 = arith.addf %154, %156 : vector<8x256xf32>
    %cst_39 = arith.constant 0.000000e+00 : f32
    %158 = vector.broadcast %cst_39 : f32 to vector<8x256xf32>
    %159 = arith.maximumf %157, %158 : vector<8x256xf32>
    %cst_40 = arith.constant dense<0.000000e+00> : vector<4x256xf32>
    %160 = tpu.matmul %1, %159, %cst_40 {dimension_numbers = #tpu.dot_dimension_numbers<[1], [0], [0], [1], [0, 0, 1, 1], [], []>} : vector<4x8xf32>, vector<8x256xf32>, vector<4x256xf32> -> vector<4x256xf32>
    %cst_41 = arith.constant dense<0.000000e+00> : vector<4xf32>
    %161 = vector.multi_reduction <add>, %160, %cst_41 [1] : vector<4x256xf32> to vector<4xf32>
    %162 = vector.shape_cast %161 : vector<4xf32> to vector<4x1xf32>
    %cst_42 = arith.constant 2.560000e+02 : f32
    %163 = vector.broadcast %cst_42 : f32 to vector<4x1xf32>
    %164 = arith.divf %162, %163 : vector<4x1xf32>
    %165 = arith.mulf %160, %160 : vector<4x256xf32>
    %cst_43 = arith.constant dense<0.000000e+00> : vector<4xf32>
    %166 = vector.multi_reduction <add>, %165, %cst_43 [1] : vector<4x256xf32> to vector<4xf32>
    %167 = vector.shape_cast %166 : vector<4xf32> to vector<4x1xf32>
    %cst_44 = arith.constant 2.560000e+02 : f32
    %168 = vector.broadcast %cst_44 : f32 to vector<4x1xf32>
    %169 = arith.divf %167, %168 : vector<4x1xf32>
    %170 = arith.mulf %164, %164 : vector<4x1xf32>
    %171 = arith.subf %169, %170 : vector<4x1xf32>
    %cst_45 = arith.constant 0.000000e+00 : f32
    %172 = vector.broadcast %cst_45 : f32 to vector<4x1xf32>
    %173 = arith.maximumf %171, %172 : vector<4x1xf32>
    %174 = vector.broadcast %164 : vector<4x1xf32> to vector<4x256xf32>
    %175 = arith.subf %160, %174 : vector<4x256xf32>
    %cst_46 = arith.constant 9.99999974E-6 : f32
    %176 = vector.broadcast %cst_46 : f32 to vector<4x1xf32>
    %177 = arith.addf %173, %176 : vector<4x1xf32>
    %178 = math.rsqrt %177 : vector<4x1xf32>
    %179 = vector.broadcast %178 : vector<4x1xf32> to vector<4x256xf32>
    %180 = arith.mulf %175, %179 : vector<4x256xf32>
    %181 = vector.extract_strided_slice %10 {offsets = [88, 0], sizes = [4, 1], strides = [1, 1]} : vector<104x2xf32> to vector<4x1xf32>
    %182 = vector.broadcast %181 : vector<4x1xf32> to vector<4x256xf32>
    %183 = arith.mulf %180, %182 : vector<4x256xf32>
    %184 = vector.extract_strided_slice %10 {offsets = [92, 0], sizes = [4, 1], strides = [1, 1]} : vector<104x2xf32> to vector<4x1xf32>
    %185 = vector.broadcast %184 : vector<4x1xf32> to vector<4x256xf32>
    %186 = arith.addf %183, %185 : vector<4x256xf32>
    %c0_47 = arith.constant 0 : index
    %c0_48 = arith.constant 0 : index
    %187 = vector.load %arg3[%c0_47, %c0_48] : memref<8x256xf32, #tpu.memory_space<vmem>>, vector<4x256xf32>
    %188 = vector.extract_strided_slice %24 {offsets = [0, 0], sizes = [4, 1], strides = [1, 1]} : vector<4x2xf32> to vector<4x1xf32>
    %189 = vector.broadcast %188 : vector<4x1xf32> to vector<4x256xf32>
    %190 = arith.mulf %187, %189 : vector<4x256xf32>
    %191 = arith.addf %186, %190 : vector<4x256xf32>
    %c0_49 = arith.constant 0 : index
    %c0_50 = arith.constant 0 : index
    %192 = vector.load %arg4[%c0_49, %c0_50] : memref<8x256xf32, #tpu.memory_space<vmem>>, vector<4x256xf32>
    tpu.vector_store %arg4[%c0_49, %c0_50], %191 {strides = array<i32>} : memref<8x256xf32, #tpu.memory_space<vmem>>, vector<4x256xf32>,
    %193 = vector.extract_strided_slice %10 {offsets = [0, 1], sizes = [4, 1], strides = [1, 1]} : vector<104x2xf32> to vector<4x1xf32>
    %c18 = arith.constant 18 : index
    %c0_51 = arith.constant 0 : index
    %194 = vector.load %arg2[%c18, %c0_51] : memref<36x256xf32, #tpu.memory_space<vmem>>, vector<1x256xf32>
    %195 = vector.broadcast %193 : vector<4x1xf32> to vector<4x256xf32>
    %196 = vector.broadcast %194 : vector<1x256xf32> to vector<4x256xf32>
    %197 = arith.mulf %195, %196 : vector<4x256xf32>
    %198 = vector.extract_strided_slice %10 {offsets = [8, 1], sizes = [4, 1], strides = [1, 1]} : vector<104x2xf32> to vector<4x1xf32>
    %c19 = arith.constant 19 : index
    %c0_52 = arith.constant 0 : index
    %199 = vector.load %arg2[%c19, %c0_52] : memref<36x256xf32, #tpu.memory_space<vmem>>, vector<1x256xf32>
    %200 = vector.broadcast %198 : vector<4x1xf32> to vector<4x256xf32>
    %201 = vector.broadcast %199 : vector<1x256xf32> to vector<4x256xf32>
    %202 = arith.mulf %200, %201 : vector<4x256xf32>
    %203 = arith.addf %197, %202 : vector<4x256xf32>
    %204 = vector.extract_strided_slice %10 {offsets = [16, 1], sizes = [4, 1], strides = [1, 1]} : vector<104x2xf32> to vector<4x1xf32>
    %c20 = arith.constant 20 : index
    %c0_53 = arith.constant 0 : index
    %205 = vector.load %arg2[%c20, %c0_53] : memref<36x256xf32, #tpu.memory_space<vmem>>, vector<1x256xf32>
    %206 = vector.broadcast %204 : vector<4x1xf32> to vector<4x256xf32>
    %207 = vector.broadcast %205 : vector<1x256xf32> to vector<4x256xf32>
    %208 = arith.mulf %206, %207 : vector<4x256xf32>
    %209 = arith.addf %203, %208 : vector<4x256xf32>
    %210 = vector.extract_strided_slice %10 {offsets = [24, 1], sizes = [4, 1], strides = [1, 1]} : vector<104x2xf32> to vector<4x1xf32>
    %c21 = arith.constant 21 : index
    %c0_54 = arith.constant 0 : index
    %211 = vector.load %arg2[%c21, %c0_54] : memref<36x256xf32, #tpu.memory_space<vmem>>, vector<1x256xf32>
    %212 = vector.broadcast %210 : vector<4x1xf32> to vector<4x256xf32>
    %213 = vector.broadcast %211 : vector<1x256xf32> to vector<4x256xf32>
    %214 = arith.mulf %212, %213 : vector<4x256xf32>
    %215 = arith.addf %209, %214 : vector<4x256xf32>
    %216 = vector.extract_strided_slice %10 {offsets = [32, 1], sizes = [4, 1], strides = [1, 1]} : vector<104x2xf32> to vector<4x1xf32>
    %c22 = arith.constant 22 : index
    %c0_55 = arith.constant 0 : index
    %217 = vector.load %arg2[%c22, %c0_55] : memref<36x256xf32, #tpu.memory_space<vmem>>, vector<1x256xf32>
    %218 = vector.broadcast %216 : vector<4x1xf32> to vector<4x256xf32>
    %219 = vector.broadcast %217 : vector<1x256xf32> to vector<4x256xf32>
    %220 = arith.mulf %218, %219 : vector<4x256xf32>
    %221 = arith.addf %215, %220 : vector<4x256xf32>
    %222 = vector.extract_strided_slice %10 {offsets = [40, 1], sizes = [4, 1], strides = [1, 1]} : vector<104x2xf32> to vector<4x1xf32>
    %c23 = arith.constant 23 : index
    %c0_56 = arith.constant 0 : index
    %223 = vector.load %arg2[%c23, %c0_56] : memref<36x256xf32, #tpu.memory_space<vmem>>, vector<1x256xf32>
    %224 = vector.broadcast %222 : vector<4x1xf32> to vector<4x256xf32>
    %225 = vector.broadcast %223 : vector<1x256xf32> to vector<4x256xf32>
    %226 = arith.mulf %224, %225 : vector<4x256xf32>
    %227 = arith.addf %221, %226 : vector<4x256xf32>
    %228 = vector.extract_strided_slice %10 {offsets = [48, 1], sizes = [4, 1], strides = [1, 1]} : vector<104x2xf32> to vector<4x1xf32>
    %c24 = arith.constant 24 : index
    %c0_57 = arith.constant 0 : index
    %229 = vector.load %arg2[%c24, %c0_57] : memref<36x256xf32, #tpu.memory_space<vmem>>, vector<1x256xf32>
    %230 = vector.broadcast %228 : vector<4x1xf32> to vector<4x256xf32>
    %231 = vector.broadcast %229 : vector<1x256xf32> to vector<4x256xf32>
    %232 = arith.mulf %230, %231 : vector<4x256xf32>
    %233 = arith.addf %227, %232 : vector<4x256xf32>
    %234 = vector.extract_strided_slice %10 {offsets = [56, 1], sizes = [4, 1], strides = [1, 1]} : vector<104x2xf32> to vector<4x1xf32>
    %c25 = arith.constant 25 : index
    %c0_58 = arith.constant 0 : index
    %235 = vector.load %arg2[%c25, %c0_58] : memref<36x256xf32, #tpu.memory_space<vmem>>, vector<1x256xf32>
    %236 = vector.broadcast %234 : vector<4x1xf32> to vector<4x256xf32>
    %237 = vector.broadcast %235 : vector<1x256xf32> to vector<4x256xf32>
    %238 = arith.mulf %236, %237 : vector<4x256xf32>
    %239 = arith.addf %233, %238 : vector<4x256xf32>
    %240 = vector.extract_strided_slice %10 {offsets = [64, 1], sizes = [4, 1], strides = [1, 1]} : vector<104x2xf32> to vector<4x1xf32>
    %c26 = arith.constant 26 : index
    %c0_59 = arith.constant 0 : index
    %241 = vector.load %arg2[%c26, %c0_59] : memref<36x256xf32, #tpu.memory_space<vmem>>, vector<1x256xf32>
    %242 = vector.broadcast %240 : vector<4x1xf32> to vector<4x256xf32>
    %243 = vector.broadcast %241 : vector<1x256xf32> to vector<4x256xf32>
    %244 = arith.mulf %242, %243 : vector<4x256xf32>
    %245 = arith.addf %239, %244 : vector<4x256xf32>
    %246 = vector.extract_strided_slice %10 {offsets = [4, 1], sizes = [4, 1], strides = [1, 1]} : vector<104x2xf32> to vector<4x1xf32>
    %c27 = arith.constant 27 : index
    %c0_60 = arith.constant 0 : index
    %247 = vector.load %arg2[%c27, %c0_60] : memref<36x256xf32, #tpu.memory_space<vmem>>, vector<1x256xf32>
    %248 = vector.broadcast %246 : vector<4x1xf32> to vector<4x256xf32>
    %249 = vector.broadcast %247 : vector<1x256xf32> to vector<4x256xf32>
    %250 = arith.mulf %248, %249 : vector<4x256xf32>
    %251 = vector.extract_strided_slice %10 {offsets = [12, 1], sizes = [4, 1], strides = [1, 1]} : vector<104x2xf32> to vector<4x1xf32>
    %c28 = arith.constant 28 : index
    %c0_61 = arith.constant 0 : index
    %252 = vector.load %arg2[%c28, %c0_61] : memref<36x256xf32, #tpu.memory_space<vmem>>, vector<1x256xf32>
    %253 = vector.broadcast %251 : vector<4x1xf32> to vector<4x256xf32>
    %254 = vector.broadcast %252 : vector<1x256xf32> to vector<4x256xf32>
    %255 = arith.mulf %253, %254 : vector<4x256xf32>
    %256 = arith.addf %250, %255 : vector<4x256xf32>
    %257 = vector.extract_strided_slice %10 {offsets = [20, 1], sizes = [4, 1], strides = [1, 1]} : vector<104x2xf32> to vector<4x1xf32>
    %c29 = arith.constant 29 : index
    %c0_62 = arith.constant 0 : index
    %258 = vector.load %arg2[%c29, %c0_62] : memref<36x256xf32, #tpu.memory_space<vmem>>, vector<1x256xf32>
    %259 = vector.broadcast %257 : vector<4x1xf32> to vector<4x256xf32>
    %260 = vector.broadcast %258 : vector<1x256xf32> to vector<4x256xf32>
    %261 = arith.mulf %259, %260 : vector<4x256xf32>
    %262 = arith.addf %256, %261 : vector<4x256xf32>
    %263 = vector.extract_strided_slice %10 {offsets = [28, 1], sizes = [4, 1], strides = [1, 1]} : vector<104x2xf32> to vector<4x1xf32>
    %c30 = arith.constant 30 : index
    %c0_63 = arith.constant 0 : index
    %264 = vector.load %arg2[%c30, %c0_63] : memref<36x256xf32, #tpu.memory_space<vmem>>, vector<1x256xf32>
    %265 = vector.broadcast %263 : vector<4x1xf32> to vector<4x256xf32>
    %266 = vector.broadcast %264 : vector<1x256xf32> to vector<4x256xf32>
    %267 = arith.mulf %265, %266 : vector<4x256xf32>
    %268 = arith.addf %262, %267 : vector<4x256xf32>
    %269 = vector.extract_strided_slice %10 {offsets = [36, 1], sizes = [4, 1], strides = [1, 1]} : vector<104x2xf32> to vector<4x1xf32>
    %c31 = arith.constant 31 : index
    %c0_64 = arith.constant 0 : index
    %270 = vector.load %arg2[%c31, %c0_64] : memref<36x256xf32, #tpu.memory_space<vmem>>, vector<1x256xf32>
    %271 = vector.broadcast %269 : vector<4x1xf32> to vector<4x256xf32>
    %272 = vector.broadcast %270 : vector<1x256xf32> to vector<4x256xf32>
    %273 = arith.mulf %271, %272 : vector<4x256xf32>
    %274 = arith.addf %268, %273 : vector<4x256xf32>
    %275 = vector.extract_strided_slice %10 {offsets = [44, 1], sizes = [4, 1], strides = [1, 1]} : vector<104x2xf32> to vector<4x1xf32>
    %c32 = arith.constant 32 : index
    %c0_65 = arith.constant 0 : index
    %276 = vector.load %arg2[%c32, %c0_65] : memref<36x256xf32, #tpu.memory_space<vmem>>, vector<1x256xf32>
    %277 = vector.broadcast %275 : vector<4x1xf32> to vector<4x256xf32>
    %278 = vector.broadcast %276 : vector<1x256xf32> to vector<4x256xf32>
    %279 = arith.mulf %277, %278 : vector<4x256xf32>
    %280 = arith.addf %274, %279 : vector<4x256xf32>
    %281 = vector.extract_strided_slice %10 {offsets = [52, 1], sizes = [4, 1], strides = [1, 1]} : vector<104x2xf32> to vector<4x1xf32>
    %c33 = arith.constant 33 : index
    %c0_66 = arith.constant 0 : index
    %282 = vector.load %arg2[%c33, %c0_66] : memref<36x256xf32, #tpu.memory_space<vmem>>, vector<1x256xf32>
    %283 = vector.broadcast %281 : vector<4x1xf32> to vector<4x256xf32>
    %284 = vector.broadcast %282 : vector<1x256xf32> to vector<4x256xf32>
    %285 = arith.mulf %283, %284 : vector<4x256xf32>
    %286 = arith.addf %280, %285 : vector<4x256xf32>
    %287 = vector.extract_strided_slice %10 {offsets = [60, 1], sizes = [4, 1], strides = [1, 1]} : vector<104x2xf32> to vector<4x1xf32>
    %c34 = arith.constant 34 : index
    %c0_67 = arith.constant 0 : index
    %288 = vector.load %arg2[%c34, %c0_67] : memref<36x256xf32, #tpu.memory_space<vmem>>, vector<1x256xf32>
    %289 = vector.broadcast %287 : vector<4x1xf32> to vector<4x256xf32>
    %290 = vector.broadcast %288 : vector<1x256xf32> to vector<4x256xf32>
    %291 = arith.mulf %289, %290 : vector<4x256xf32>
    %292 = arith.addf %286, %291 : vector<4x256xf32>
    %293 = vector.extract_strided_slice %10 {offsets = [68, 1], sizes = [4, 1], strides = [1, 1]} : vector<104x2xf32> to vector<4x1xf32>
    %c35 = arith.constant 35 : index
    %c0_68 = arith.constant 0 : index
    %294 = vector.load %arg2[%c35, %c0_68] : memref<36x256xf32, #tpu.memory_space<vmem>>, vector<1x256xf32>
    %295 = vector.broadcast %293 : vector<4x1xf32> to vector<4x256xf32>
    %296 = vector.broadcast %294 : vector<1x256xf32> to vector<4x256xf32>
    %297 = arith.mulf %295, %296 : vector<4x256xf32>
    %298 = arith.addf %292, %297 : vector<4x256xf32>
    %299 = tpu.concatenate %245, %298 in 0 : vector<4x256xf32>, vector<4x256xf32> -> vector<8x256xf32>
    %cst_69 = arith.constant dense<0.000000e+00> : vector<8xf32>
    %300 = vector.multi_reduction <add>, %299, %cst_69 [1] : vector<8x256xf32> to vector<8xf32>
    %301 = vector.shape_cast %300 : vector<8xf32> to vector<8x1xf32>
    %cst_70 = arith.constant 2.560000e+02 : f32
    %302 = vector.broadcast %cst_70 : f32 to vector<8x1xf32>
    %303 = arith.divf %301, %302 : vector<8x1xf32>
    %304 = arith.mulf %299, %299 : vector<8x256xf32>
    %cst_71 = arith.constant dense<0.000000e+00> : vector<8xf32>
    %305 = vector.multi_reduction <add>, %304, %cst_71 [1] : vector<8x256xf32> to vector<8xf32>
    %306 = vector.shape_cast %305 : vector<8xf32> to vector<8x1xf32>
    %cst_72 = arith.constant 2.560000e+02 : f32
    %307 = vector.broadcast %cst_72 : f32 to vector<8x1xf32>
    %308 = arith.divf %306, %307 : vector<8x1xf32>
    %309 = arith.mulf %303, %303 : vector<8x1xf32>
    %310 = arith.subf %308, %309 : vector<8x1xf32>
    %cst_73 = arith.constant 0.000000e+00 : f32
    %311 = vector.broadcast %cst_73 : f32 to vector<8x1xf32>
    %312 = arith.maximumf %310, %311 : vector<8x1xf32>
    %313 = vector.broadcast %303 : vector<8x1xf32> to vector<8x256xf32>
    %314 = arith.subf %299, %313 : vector<8x256xf32>
    %cst_74 = arith.constant 9.99999974E-6 : f32
    %315 = vector.broadcast %cst_74 : f32 to vector<8x1xf32>
    %316 = arith.addf %312, %315 : vector<8x1xf32>
    %317 = math.rsqrt %316 : vector<8x1xf32>
    %318 = vector.broadcast %317 : vector<8x1xf32> to vector<8x256xf32>
    %319 = arith.mulf %314, %318 : vector<8x256xf32>
    %320 = vector.extract_strided_slice %10 {offsets = [72, 1], sizes = [8, 1], strides = [1, 1]} : vector<104x2xf32> to vector<8x1xf32>
    %321 = vector.broadcast %320 : vector<8x1xf32> to vector<8x256xf32>
    %322 = arith.mulf %319, %321 : vector<8x256xf32>
    %323 = vector.extract_strided_slice %10 {offsets = [80, 1], sizes = [8, 1], strides = [1, 1]} : vector<104x2xf32> to vector<8x1xf32>
    %324 = vector.broadcast %323 : vector<8x1xf32> to vector<8x256xf32>
    %325 = arith.addf %322, %324 : vector<8x256xf32>
    %cst_75 = arith.constant 0.000000e+00 : f32
    %326 = vector.broadcast %cst_75 : f32 to vector<8x256xf32>
    %327 = arith.maximumf %325, %326 : vector<8x256xf32>
    %cst_76 = arith.constant dense<0.000000e+00> : vector<4x256xf32>
    %328 = tpu.matmul %1, %327, %cst_76 {dimension_numbers = #tpu.dot_dimension_numbers<[1], [0], [0], [1], [0, 0, 1, 1], [], []>} : vector<4x8xf32>, vector<8x256xf32>, vector<4x256xf32> -> vector<4x256xf32>
    %cst_77 = arith.constant dense<0.000000e+00> : vector<4xf32>
    %329 = vector.multi_reduction <add>, %328, %cst_77 [1] : vector<4x256xf32> to vector<4xf32>
    %330 = vector.shape_cast %329 : vector<4xf32> to vector<4x1xf32>
    %cst_78 = arith.constant 2.560000e+02 : f32
    %331 = vector.broadcast %cst_78 : f32 to vector<4x1xf32>
    %332 = arith.divf %330, %331 : vector<4x1xf32>
    %333 = arith.mulf %328, %328 : vector<4x256xf32>
    %cst_79 = arith.constant dense<0.000000e+00> : vector<4xf32>
    %334 = vector.multi_reduction <add>, %333, %cst_79 [1] : vector<4x256xf32> to vector<4xf32>
    %335 = vector.shape_cast %334 : vector<4xf32> to vector<4x1xf32>
    %cst_80 = arith.constant 2.560000e+02 : f32
    %336 = vector.broadcast %cst_80 : f32 to vector<4x1xf32>
    %337 = arith.divf %335, %336 : vector<4x1xf32>
    %338 = arith.mulf %332, %332 : vector<4x1xf32>
    %339 = arith.subf %337, %338 : vector<4x1xf32>
    %cst_81 = arith.constant 0.000000e+00 : f32
    %340 = vector.broadcast %cst_81 : f32 to vector<4x1xf32>
    %341 = arith.maximumf %339, %340 : vector<4x1xf32>
    %342 = vector.broadcast %332 : vector<4x1xf32> to vector<4x256xf32>
    %343 = arith.subf %328, %342 : vector<4x256xf32>
    %cst_82 = arith.constant 9.99999974E-6 : f32
    %344 = vector.broadcast %cst_82 : f32 to vector<4x1xf32>
    %345 = arith.addf %341, %344 : vector<4x1xf32>
    %346 = math.rsqrt %345 : vector<4x1xf32>
    %347 = vector.broadcast %346 : vector<4x1xf32> to vector<4x256xf32>
    %348 = arith.mulf %343, %347 : vector<4x256xf32>
    %349 = vector.extract_strided_slice %10 {offsets = [88, 1], sizes = [4, 1], strides = [1, 1]} : vector<104x2xf32> to vector<4x1xf32>
    %350 = vector.broadcast %349 : vector<4x1xf32> to vector<4x256xf32>
    %351 = arith.mulf %348, %350 : vector<4x256xf32>
    %352 = vector.extract_strided_slice %10 {offsets = [92, 1], sizes = [4, 1], strides = [1, 1]} : vector<104x2xf32> to vector<4x1xf32>
    %353 = vector.broadcast %352 : vector<4x1xf32> to vector<4x256xf32>
    %354 = arith.addf %351, %353 : vector<4x256xf32>
    %c4_83 = arith.constant 4 : index
    %c0_84 = arith.constant 0 : index
    %355 = vector.load %arg3[%c4_83, %c0_84] : memref<8x256xf32, #tpu.memory_space<vmem>>, vector<4x256xf32>
    %356 = vector.extract_strided_slice %24 {offsets = [0, 1], sizes = [4, 1], strides = [1, 1]} : vector<4x2xf32> to vector<4x1xf32>
    %357 = vector.broadcast %356 : vector<4x1xf32> to vector<4x256xf32>
    %358 = arith.mulf %355, %357 : vector<4x256xf32>
    %359 = arith.addf %354, %358 : vector<4x256xf32>
    %c4_85 = arith.constant 4 : index
    %c0_86 = arith.constant 0 : index
    %360 = vector.load %arg4[%c4_85, %c0_86] : memref<8x256xf32, #tpu.memory_space<vmem>>, vector<4x256xf32>
    tpu.vector_store %arg4[%c4_85, %c0_86], %359 {strides = array<i32>} : memref<8x256xf32, #tpu.memory_space<vmem>>, vector<4x256xf32>,
    return
  }
}

</mosaic_0001>

<bundles_post_ra>
// kernel: residual_block_pallas.1
= control target key start
LH: loop header
LB: loop body
LE: loop exit
PB: predicated region body
PF: predicated region fallthrough
CT: control target
= control target key end

     0   :  { %v1514_v0 = vmov 0.0|0.0   ;;  %vm1515_vm0 = vmmov 0   ;;  %v2330_v6 = vmov 0.0   ;;  %vm36_vm1 = vcmask 261120   ;;  %s1519_s24 = smov 112   ;;  %s1520_s17 = smov 120   ;;  %s2325_s1 = inlined_call_operand.vmem [shape: f32[32,2], index: 1, kind: input, shape index: {}]   ;;  %s2326_s0 = inlined_call_operand.vmem [shape: f32[108,32], index: 0, kind: input, shape index: {}]   ;;  %s2327_s2 = inlined_call_operand.vmem [shape: f32[36,256], index: 2, kind: input, shape index: {}]   ;;  %s2328_s3 = inlined_call_operand.vmem [shape: f32[8,256], index: 3, kind: input, shape index: {}]   ;;  %s2329_s4 = inlined_call_operand.vmem [shape: f32[8,256], index: 4, kind: output, shape index: {}]  }
   0x1   :  { %1468 = vmatprep.subr.bf16.mxu0 %v1514_v0  ;;  %1474 = vmatprep.subr.bf16.mxu1 %v1514_v0  ;;  %v32_v1 = vld [vmem:[%s2325_s1] sm:$0xff]  ;;  %v33_v2 = vld [vmem:[%s2325_s1 + $0x8] sm:$0xff]  ;;  %v34_v3 = vld [vmem:[%s2325_s1 + $0x10] sm:$0xff]  ;;  %v2334_v19 = vmov 0   ;;  %v2332_v36 = vmov 1   ;;  %vm680_vm12 = vcmask 1043456  }
   0x2   :  { %v1469_v4 = vpack.c.bf16 %v33_v2, %v32_v1  ;;  %v35_v5 = vld [vmem:[%s2325_s1 + $0x18] sm:$0xff]  ;;  %1424 = vmatprep.mubr.msk.f32.mxu0 %vm1515_vm0, %v2330_v6  ;;  %1448 = vmatprep.mubr.msk.f32.mxu1 %vm1515_vm0, %v2330_v6  ;;  %v17_v8 = vld [vmem:[%s2326_s0] sm:$0xff]  ;;  %v18_v10 = vld [vmem:[%s2326_s0 + $0x8] sm:$0xff]  ;;  %v341_v2 = vlaneseq  ;;  %vm255_vm15 = vcmask 64512  }
   0x3   :  { %v1472_v7 = vpack.c.bf16 %v35_v5, %v34_v3  ;;  %v25_v9 = vld [vmem:[%s2326_s0 + $0x40] sm:$0xff]  ;;  %v26_v11 = vld [vmem:[%s2326_s0 + $0x48] sm:$0xff]  ;;  %v19_v12 = vld [vmem:[%s2326_s0 + $0x10] sm:$0xff]  ;;  %1489 = vset.pattern.permute.xlu1 %v2334_v19  ;;  %1487 = vset.pattern.permute.xlu0 %v2334_v19 }
   0x4   :  { %1470 = vmatpush3.bf16.msra.mxu0 %v1469_v4  ;;  %1476 = vmatpush3.bf16.msra.mxu1 %v1469_v4  ;;  %v27_v13 = vld [vmem:[%s2326_s0 + $0x50] sm:$0xff]  ;;  %v20_v14 = vld [vmem:[%s2326_s0 + $0x18] sm:$0xff]  ;;  %v21_v15 = vld [vmem:[%s2326_s0 + $0x20] sm:$0xff]  ;;  %v342_v3 = vshrl.u32 %v341_v2, 7 }
   0x5   :  { %1471 = vmatprep.subr.bf16.mxu0 %v1514_v0  ;;  %1475 = vmatprep.subr.bf16.mxu1 %v1514_v0  ;;  %v22_v16 = vld [vmem:[%s2326_s0 + $0x28] sm:$0xff]  ;;  %v23_v17 = vld [vmem:[%s2326_s0 + $0x30] sm:$0xff]  ;;  %v24_v18 = vld [vmem:[%s2326_s0 + $0x38] sm:$0xff] }
   0x6   :  { %v28_v20 = vld [vmem:[%s2326_s0 + $0x58] sm:$0xff]  ;;  %v29_v21 = vld [vmem:[%s2326_s0 + $0x60] sm:$0xff]  ;;  %v31_v62 = vld [vmem:[%s2326_s0 + $0x68] sm:$0x1]  ;;  %v1668_v5 = vsub.s32 0, %v342_v3 }
   0x7   :  { %v1666_v4 = vld [vmem:[%s2327_s2 + $0x10] ss:$8 sm:$0x3]  ;;  %v1883_v2 = vld [vmem:[%s2327_s2 + $0x17] ss:$8 sm:$0x3] }
   0x8   :  { %1473 = vmatpush3.bf16.msra.mxu0 %v1472_v7  ;;  %1477 = vmatpush3.bf16.msra.mxu1 %v1472_v7  ;;  %v1670_v7 = vsub.s32 1, %v342_v3 }
   0x9   :  { %1463 = vmatprep.subr.mxu1 %v2330_v6 }
   0xb   :  { %1425 = vmatmul.mubr.msk.f32.vlgmr.msra.gmra.mrb[0].mxu0 %vm36_vm1, %v17_v8  ;;  %1449 = vmatmul.mubr.msk.f32.vlgmr.msra.gmra.mrb[0].mxu1 %vm36_vm1, %v25_v9  ;;  %v1675_v8 = vld [vmem:[%s2327_s2 + $0x21] ss:$8 sm:$0x3]  ;;  %v1680_v9 = vld [vmem:[%s2327_s2] ss:$8 sm:$0x3] }
   0xc   :  { %1427 = vmatprep.mubr.msk.f32.mxu0 %vm1515_vm0, %v2330_v6  ;;  %1451 = vmatprep.mubr.msk.f32.mxu1 %vm1515_vm0, %v2330_v6 }
   0xf   :  { %1428 = vmatmul.mubr.msk.f32.gmra.mrb[2].mxu0 %vm36_vm1, %v18_v10  ;;  %1452 = vmatmul.mubr.msk.f32.gmra.mrb[2].mxu1 %vm36_vm1, %v26_v11  ;;  %v1685_v10 = vld [vmem:[%s2327_s2 + $0x11] ss:$8 sm:$0x3]  ;;  %v1690_v11 = vld [vmem:[%s2327_s2 + $0x22] ss:$8 sm:$0x3] }
  0x10   :  { %1430 = vmatprep.mubr.msk.f32.mxu0 %vm1515_vm0, %v2330_v6  ;;  %1454 = vmatprep.mubr.msk.f32.mxu1 %vm1515_vm0, %v2330_v6 }
  0x13   :  { %1431 = vmatmul.mubr.msk.f32.gmra.mrb[4].mxu0 %vm36_vm1, %v19_v12  ;;  %1455 = vmatmul.mubr.msk.f32.gmra.mrb[4].mxu1 %vm36_vm1, %v27_v13  ;;  %v1695_v12 = vld [vmem:[%s2327_s2 + $0x33] ss:$8 sm:$0x3]  ;;  %v1700_v13 = vld [vmem:[%s2327_s2 + $0x23] ss:$8 sm:$0x3] }
  0x14   :  { %1433 = vmatprep.mubr.msk.f32.mxu0 %vm1515_vm0, %v2330_v6  ;;  %1457 = vmatprep.mubr.msk.f32.mxu1 %vm1515_vm0, %v2330_v6 }
  0x17   :  { %1434 = vmatmul.mubr.msk.f32.gmra.mrb[6].mxu0 %vm36_vm1, %v20_v14  ;;  %1458 = vmatmul.mubr.msk.f32.gmra.mrb[6].mxu1 %vm36_vm1, %v28_v20  ;;  %v1705_v14 = vld [vmem:[%s2327_s2 + $0x34] ss:$8 sm:$0x3]  ;;  %v1724_v20 = vld [vmem:[%s2327_s2 + $0x2] ss:$8 sm:$0x3] }
  0x18   :  { %1436 = vmatprep.mubr.msk.f32.mxu0 %vm1515_vm0, %v2330_v6  ;;  %1460 = vmatprep.mubr.msk.f32.mxu1 %vm1515_vm0, %v2330_v6 }
  0x1b   :  { %1437 = vmatmul.mubr.msk.f32.gmra.mrb[8].mxu0 %vm36_vm1, %v21_v15  ;;  %1461 = vmatmul.mubr.msk.f32.gmra.mrb[8].mxu1 %vm36_vm1, %v29_v21  ;;  %v1710_v15 = vld [vmem:[%s2327_s2 + $0x1] ss:$8 sm:$0x3] }
  0x1c   :  { %1439 = vmatprep.mubr.msk.f32.mxu0 %vm1515_vm0, %v2330_v6  ;;  %1465 = vmatprep.mubr.msk.f32.mxu1 %vm1515_vm0, %v2330_v6 }
  0x1f   :  { %1440 = vmatmul.mubr.msk.f32.gmra.mrb[10].mxu0 %vm36_vm1, %v22_v16  ;;  %v518_v16 = vrot.slane %v1666_v4, %v1668_v5 }
  0x20   :  { %1442 = vmatprep.mubr.msk.f32.mxu0 %vm1515_vm0, %v2330_v6 }
  0x23   :  { %1443 = vmatmul.mubr.msk.f32.gmra.mrb[12].mxu0 %vm36_vm1, %v23_v17  ;;  %v522_v17 = vrot.slane %v1666_v4, %v1670_v7 }
  0x24   :  { %1445 = vmatprep.mubr.msk.f32.mxu0 %vm1515_vm0, %v2330_v6  ;;  %v1865_v6 = vld [vmem:[%s2327_s2 + $0x37] ss:$8 sm:$0x3] }
  0x27   :  { %1446 = vmatmul.mubr.msk.f32.gmra.mrb[14].mxu0 %vm36_vm1, %v24_v18  ;;  %v1719_v18 = vld [vmem:[%s2327_s2 + $0x12] ss:$8 sm:$0x3] }
  0xde   :  { %v142_v22 = vpop.f32.mrb[0].mxu0  ;;  %v182_v23 = vpop.f32.mrb[0].mxu1 }
  0xdf   :  { %v218_v24 = vmul.f32 0.1, %v142_v22  ;;  %v226_v25 = vmul.f32 0.1, %v182_v23  ;;  %v1426_v26 = vpop.f32.mrb[1].mxu0  ;;  %v1450_v27 = vpop.f32.mrb[1].mxu1 }
  0xe0   :  { %vm214_vm2 = vcmp.gt.f32.partialorder %v182_v23, 0.0  ;;  %vm206_vm3 = vcmp.gt.f32.partialorder %v142_v22, 0.0  ;;  %v1742_v26 = vld [vmem:[%s2327_s2 + $0x3] ss:$8 sm:$0x3]  ;;  %v535_v27 = vrot.slane %v1685_v10, %v1668_v5 }
  0xe1   :  { %v238_v28 = vsel %vm214_vm2, %v182_v23, %v226_v25  ;;  %v230_v29 = vsel %vm206_vm3, %v142_v22, %v218_v24  ;;  %v344_v23 = vrot.slane %v1680_v9, %v1668_v5  ;;  %v348_v24 = vrot.slane %v1680_v9, %v1670_v7  ;;  %v1737_v25 = vld [vmem:[%s2327_s2 + $0x13] ss:$8 sm:$0x3] }
  0xe2   :  { %511 = vperm.xlu1 %1489, %v238_v28   ;;  %337 = vperm.xlu0 %1487, %v230_v29   ;;  %v147_v30 = vpop.f32.mrb[2].mxu0  ;;  %v1641_v31 = vpop.f32.mrb[2].mxu1  ;;  %v2365_v21 = vrot.slane %v1737_v25, %v1670_v7 }
  0xe3   :  { %vm207_vm4 = vcmp.gt.f32.partialorder %v147_v30, 0.0  ;;  %v219_v32 = vmul.f32 0.1, %v147_v30  ;;  %v1429_v33 = vpop.f32.mrb[3].mxu0  ;;  %v1453_v34 = vpop.f32.mrb[3].mxu1  ;;  %vm215_vm11 = vcmp.gt.f32.partialorder %v1641_v31, 0.0 }
  0xe4   :  { %v227_v61 = vmul.f32 0.1, %v1641_v31  ;;  %v1032_v33 = vrot.slane %v1695_v12, %v1668_v5  ;;  %v1036_v34 = vrot.slane %v1695_v12, %v1670_v7  ;;  %v2358_v12 = vrot.slane %v1710_v15, %v1668_v5 }
  0xe5   :  { %v231_v35 = vsel %vm207_vm4, %v147_v30, %v219_v32  ;;  %v853_v30 = vrot.slane %v1690_v11, %v1670_v7  ;;  %v1760_v32 = vld [vmem:[%s2327_s2 + $0x24] ss:$8 sm:$0x3] }
  0xe6   :  { %1491 = vset.pattern.permute.xlu1 %v2332_v36  ;;  %1488 = vset.pattern.permute.xlu0 %v2332_v36  ;;  %v152_v37 = vpop.f32.mrb[4].mxu0  ;;  %v1657_v63 = vsel %vm215_vm11, %v1641_v31, %v227_v61  ;;  %v1661_v0 = vpop.f32.mrb[4].mxu1  ;;  %v1755_v31 = vld [vmem:[%s2327_s2 + $0x14] ss:$8 sm:$0x3] }
  0xe7   :  { %v220_v38 = vmul.f32 0.1, %v152_v37  ;;  %842 = vperm.xlu0 %1488, %v230_v29   ;;  %861 = vperm.xlu1 %1491, %v231_v35   ;;  %v1432_v39 = vpop.f32.mrb[5].mxu0  ;;  %vm208_vm5 = vcmp.gt.f32.partialorder %v152_v37, 0.0  ;;  %2346 = vst [vmem:[#allocation2_spill] sm:$0xff] %v1657_v63  ;;  %2347 = vst [vmem:[#allocation3_spill] sm:$0xff] %v1661_v0  ;;  %v849_v29 = vrot.slane %v1690_v11, %v1668_v5 }
  0xe8   :  { %v1456_v1 = vpop.f32.mrb[5].mxu1  ;;  %v1888_v61 = vld [vmem:[%s2327_s2 + $0x27] ss:$8 sm:$0x3]  ;;  %v2356_v11 = vrot.slane %v1705_v14, %v1668_v5 }
  0xe9   :  { %v232_v42 = vsel %vm208_vm5, %v152_v37, %v220_v38  ;;  %v1773_v38 = vld [vmem:[%s2327_s2 + $0x35] ss:$8 sm:$0x3] }
  0xea   :  { %v157_v40 = vpop.f32.mrb[6].mxu0  ;;  %v1775_v39 = vpop.f32.mrb[6].mxu1 }
  0xeb   :  { %v221_v41 = vmul.f32 0.1, %v157_v40  ;;  %1490 = vset.pattern.permute.xlu0 %v2334_v19  ;;  %1492 = vset.pattern.permute.xlu1 %v2334_v19  ;;  %v1435_v43 = vpop.f32.mrb[7].mxu0  ;;  %vm209_vm6 = vcmp.gt.f32.partialorder %v157_v40, 0.0  ;;  %2348 = vst [vmem:[#allocation4_spill] sm:$0xff] %v1775_v39 }
  0xec   :  { %357 = vperm.xlu0 %1490, %v231_v35   ;;  %379 = vperm.xlu1 %1492, %v232_v42   ;;  %v868_v35 = vrot.slane %v1700_v13, %v1668_v5 }
  0xed   :  { %v233_v46 = vsel %vm209_vm6, %v157_v40, %v221_v41 }
  0xee   :  { %v162_v44 = vpop.f32.mrb[8].mxu0 }
  0xef   :  { %v222_v45 = vmul.f32 0.1, %v162_v44  ;;  %v1438_v47 = vpop.f32.mrb[9].mxu0  ;;  %vm210_vm7 = vcmp.gt.f32.partialorder %v162_v44, 0.0 }
  0xf0   :  { %1493 = vset.pattern.permute.xlu0 %v2332_v36  ;;  %401 = vperm.xlu1 %1492, %v233_v46   ;;  %v1962_v47 = vld [vmem:[%s2327_s2 + $0x31] ss:$8 sm:$0x3] }
  0xf1   :  { %882 = vperm.xlu0 %1493, %v232_v42   ;;  %v234_v50 = vsel %vm210_vm7, %v162_v44, %v222_v45  ;;  %v1788_v44 = vld [vmem:[%s2327_s2 + $0x4] ss:$8 sm:$0x3]  ;;  %v1459_v45 = vpop.f32.mrb[7].mxu1  ;;  %2351 = vst [vmem:[#allocation7_spill] sm:$0xff] %v1962_v47 }
  0xf2   :  { %v167_v48 = vpop.f32.mrb[10].mxu0  ;;  %v1839_v1 = vpop.f32.mrb[8].mxu1 }
  0xf3   :  { %v223_v49 = vmul.f32 0.1, %v167_v48  ;;  %v1441_v51 = vpop.f32.mrb[11].mxu0  ;;  %vm211_vm8 = vcmp.gt.f32.partialorder %v167_v48, 0.0  ;;  %2349 = vst [vmem:[#allocation5_spill] sm:$0xff] %v1839_v1 }
  0xf4   :  { %423 = vperm.xlu1 %1492, %v234_v50   ;;  %v1806_v51 = vld [vmem:[%s2327_s2 + $0x25] ss:$8 sm:$0x3] }
  0xf5   :  { %903 = vperm.xlu0 %1493, %v233_v46   ;;  %v235_v54 = vsel %vm211_vm8, %v167_v48, %v223_v49  ;;  %v1944_v49 = vld [vmem:[%s2327_s2 + $0x32] ss:$8 sm:$0x3]  ;;  %v1957_v48 = vld [vmem:[%s2327_s2 + $0x43] ss:$8 sm:$0x3] }
  0xf6   :  { %v172_v52 = vpop.f32.mrb[12].mxu0  ;;  %2350 = vst [vmem:[#allocation6_spill] sm:$0xff] %v1957_v48  ;;  %v1975_v46 = vld [vmem:[%s2327_s2 + $0x42] ss:$8 sm:$0x3] }
  0xf7   :  { %v224_v53 = vmul.f32 0.1, %v172_v52  ;;  %v1444_v55 = vpop.f32.mrb[13].mxu0  ;;  %vm212_vm9 = vcmp.gt.f32.partialorder %v172_v52, 0.0  ;;  %2352 = vst [vmem:[#allocation8_spill] sm:$0xff] %v1975_v46 }
  0xf8   :  { %445 = vperm.xlu1 %1492, %v235_v54   ;;  %v1908_v55 = vld [vmem:[%s2327_s2 + $0x7] ss:$8 sm:$0x3] }
  0xf9   :  { %924 = vperm.xlu0 %1493, %v234_v50   ;;  %v236_v58 = vsel %vm212_vm9, %v172_v52, %v224_v53  ;;  %v1801_v50 = vld [vmem:[%s2327_s2 + $0x15] ss:$8 sm:$0x3]  ;;  %v1926_v53 = vld [vmem:[%s2327_s2 + $0x30] ss:$8 sm:$0x3] }
  0xfa   :  { %v177_v56 = vpop.f32.mrb[14].mxu0  ;;  %v1939_v52 = vld [vmem:[%s2327_s2 + $0x41] ss:$8 sm:$0x3] }
  0xfb   :  { %v225_v57 = vmul.f32 0.1, %v177_v56  ;;  %v1447_v59 = vpop.f32.mrb[15].mxu0  ;;  %vm213_vm10 = vcmp.gt.f32.partialorder %v177_v56, 0.0 }
  0xfc   :  { %467 = vperm.xlu1 %1492, %v236_v58  }
  0xfd   :  { %945 = vperm.xlu0 %1493, %v235_v54   ;;  %v237_v60 = vsel %vm213_vm10, %v177_v56, %v225_v57  ;;  %v1819_v56 = vld [vmem:[%s2327_s2 + $0x36] ss:$8 sm:$0x3]  ;;  %v1824_v57 = vld [vmem:[%s2327_s2 + $0x5] ss:$8 sm:$0x3] }
  0xfe   :  { %v1921_v54 = vld [vmem:[%s2327_s2 + $0x20] ss:$8 sm:$0x3] }
 0x100   :  { %489 = vperm.xlu1 %1492, %v237_v60  }
 0x101   :  { %966 = vperm.xlu0 %1493, %v236_v58   ;;  %v1903_v58 = vld [vmem:[%s2327_s2 + $0x40] ss:$8 sm:$0x3] }
 0x104   :  { %1494 = vset.pattern.permute.xlu1 %v2332_v36 }
 0x105   :  { %1008 = vperm.xlu0 %1493, %v238_v28   ;;  %987 = vperm.xlu1 %1494, %v237_v60   ;;  %v539_v28 = vrot.slane %v1685_v10, %v1670_v7 }
 0x109   :  { %245 = vrot.lane.b32.xlu1 %v31_v62, %s1519_s24  ;;  %1496 = vset.pattern.permute.xlu0 %v2334_v19  ;;  %v1837_v62 = vld [vmem:[%s2327_s2 + $0x16] ss:$8 sm:$0x3] }
 0x10a   :  { %1495 = vset.pattern.permute.xlu1 %v2334_v19  ;;  %v1462_v19 = vpop.f32.mrb[9].mxu1 }
 0x10b   :  { %v1870_v19 = vld [vmem:[%s2327_s2 + $0x6] ss:$8 sm:$0x3] }
 0x10d   :  { %705 = vperm.xlu1 %1495, %v1657_v63  }
 0x111   :  { %1497 = vset.pattern.permute.xlu1 %v2332_v36  ;;  %v1852_v36 = vld [vmem:[%s2327_s2 + $0x26] ss:$8 sm:$0x3] }
 0x161   :  { %v1890_v22 = vpop.permute.xlu1 %511  ;;  %v338_v60 = vpop.permute.xlu0 %337 }
 0x162   :  { %v1997_v3 = vmul.f32 %v518_v16, %v1890_v22  ;;  %v2003_v59 = vmul.f32 %v522_v17, %v1890_v22  ;;  %v351_v41 = vmul.f32 %v344_v23, %v338_v60  ;;  %v352_v16 = vmul.f32 %v348_v24, %v338_v60 }
 0x163   :  { %v542_v4 = vmul.f32 %v535_v27, %v338_v60  ;;  %v543_v17 = vmul.f32 %v539_v28, %v338_v60  ;;  %v2355_v27 = vrot.slane %v1700_v13, %v1670_v7  ;;  %v2360_v13 = vrot.slane %v1719_v18, %v1668_v5 }
 0x164   :  { %2353 = vst [vmem:[#allocation9_spill] sm:$0xff] %v1997_v3  ;;  %2354 = vst [vmem:[#allocation10_spill] sm:$0xff] %v2003_v59 }
 0x166   :  { %v843_v43 = vpop.permute.xlu0 %842  ;;  %v862_v42 = vpop.permute.xlu1 %861 }
 0x167   :  { %v856_v37 = vmul.f32 %v849_v29, %v843_v43  ;;  %v857_v23 = vmul.f32 %v853_v30, %v843_v43  ;;  %v1039_v9 = vmul.f32 %v1032_v33, %v843_v43  ;;  %v1040_v24 = vmul.f32 %v1036_v34, %v843_v43 }
 0x168   :  { %v875_v10 = vmul.f32 %v868_v35, %v862_v42  ;;  %v876_v28 = vmul.f32 %v2355_v27, %v862_v42  ;;  %v1054_v29 = vmul.f32 %v2356_v11, %v862_v42  ;;  %v2357_v30 = vrot.slane %v1705_v14, %v1670_v7 }
 0x169   :  { %v2359_v35 = vrot.slane %v1710_v15, %v1670_v7  ;;  %v2361_v11 = vrot.slane %v1719_v18, %v1670_v7  ;;  %v2362_v14 = vrot.slane %v1724_v20, %v1668_v5  ;;  %v2364_v15 = vrot.slane %v1737_v25, %v1668_v5 }
 0x16a   :  { %v1055_v33 = vmul.f32 %v2357_v30, %v862_v42  ;;  %v2363_v30 = vrot.slane %v1724_v20, %v1670_v7  ;;  %v878_v63 = vadd.f32 %v876_v28, %v857_v23  ;;  %v1056_v0 = vadd.f32 %v1054_v29, %v1039_v9 }
 0x16b   :  { %v358_v60 = vpop.permute.xlu0 %357  ;;  %v380_v40 = vpop.permute.xlu1 %379  ;;  %v2373_v23 = vrot.slane %v1773_v38, %v1670_v7 }
 0x16c   :  { %v371_v34 = vmul.f32 %v2358_v12, %v358_v60  ;;  %v372_v43 = vmul.f32 %v2359_v35, %v358_v60  ;;  %v557_v27 = vmul.f32 %v2360_v13, %v358_v60  ;;  %v558_v45 = vmul.f32 %v2361_v11, %v358_v60 }
 0x16d   :  { %v393_v42 = vmul.f32 %v2362_v14, %v380_v40  ;;  %v394_v12 = vmul.f32 %v2363_v30, %v380_v40  ;;  %v574_v35 = vmul.f32 %v2364_v15, %v380_v40  ;;  %v575_v13 = vmul.f32 %v2365_v21, %v380_v40 }
 0x16e   :  { %v373_v1 = vadd.f32 %v371_v34, %v351_v41  ;;  %v374_v39 = vadd.f32 %v372_v43, %v352_v16  ;;  %v559_v18 = vadd.f32 %v557_v27, %v542_v4  ;;  %v560_v60 = vadd.f32 %v558_v45, %v543_v17 }
 0x16f   :  { %v877_v11 = vadd.f32 %v875_v10, %v856_v37  ;;  %v1057_v14 = vadd.f32 %v1055_v33, %v1040_v24  ;;  %v402_v48 = vpop.permute.xlu1 %401  ;;  %v2366_v15 = vrot.slane %v1742_v26, %v1668_v5  ;;  %v2367_v21 = vrot.slane %v1742_v26, %v1670_v7 }
 0x170   :  { %v395_v59 = vadd.f32 %v393_v42, %v373_v1  ;;  %v396_v20 = vadd.f32 %v394_v12, %v374_v39  ;;  %v576_v30 = vadd.f32 %v574_v35, %v559_v18  ;;  %v577_v3 = vadd.f32 %v575_v13, %v560_v60  ;;  %v883_v46 = vpop.permute.xlu0 %882 }
 0x171   :  { %v415_v47 = vmul.f32 %v2366_v15, %v402_v48  ;;  %v416_v25 = vmul.f32 %v2367_v21, %v402_v48  ;;  %v2368_v37 = vrot.slane %v1755_v31, %v1668_v5  ;;  %v2369_v41 = vrot.slane %v1755_v31, %v1670_v7 }
 0x172   :  { %v2370_v39 = vrot.slane %v1760_v32, %v1668_v5  ;;  %v2371_v16 = vrot.slane %v1760_v32, %v1670_v7  ;;  %v2372_v26 = vrot.slane %v1773_v38, %v1668_v5  ;;  %v1072_v9 = vmul.f32 %v2373_v23, %v883_v46 }
 0x173   :  { %v591_v40 = vmul.f32 %v2368_v37, %v402_v48  ;;  %v592_v1 = vmul.f32 %v2369_v41, %v402_v48  ;;  %v417_v24 = vadd.f32 %v415_v47, %v395_v59  ;;  %v418_v10 = vadd.f32 %v416_v25, %v396_v20  ;;  %v424_v28 = vpop.permute.xlu1 %423 }
 0x174   :  { %v896_v45 = vmul.f32 %v2370_v39, %v883_v46  ;;  %v897_v4 = vmul.f32 %v2371_v16, %v883_v46  ;;  %v1071_v17 = vmul.f32 %v2372_v26, %v883_v46  ;;  %v1074_v43 = vadd.f32 %v1072_v9, %v1057_v14  ;;  %v904_v27 = vpop.permute.xlu0 %903 }
 0x175   :  { %v593_v31 = vadd.f32 %v591_v40, %v576_v30  ;;  %v594_v48 = vadd.f32 %v592_v1, %v577_v3  ;;  %v2374_v32 = vrot.slane %v1788_v44, %v1668_v5  ;;  %v2375_v12 = vrot.slane %v1788_v44, %v1670_v7 }
 0x176   :  { %v898_v29 = vadd.f32 %v896_v45, %v877_v11  ;;  %v899_v33 = vadd.f32 %v897_v4, %v878_v63  ;;  %v1073_v34 = vadd.f32 %v1071_v17, %v1056_v0  ;;  %v2376_v38 = vrot.slane %v1801_v50, %v1668_v5 }
 0x177   :  { %v437_v42 = vmul.f32 %v2374_v32, %v424_v28  ;;  %v438_v35 = vmul.f32 %v2375_v12, %v424_v28  ;;  %v2377_v47 = vrot.slane %v1801_v50, %v1670_v7  ;;  %v2378_v63 = vrot.slane %v1806_v51, %v1668_v5  ;;  %v446_v15 = vpop.permute.xlu1 %445 }
 0x178   :  { %v608_v46 = vmul.f32 %v2376_v38, %v424_v28  ;;  %v2379_v3 = vrot.slane %v1806_v51, %v1670_v7  ;;  %v2380_v44 = vrot.slane %v1819_v56, %v1668_v5  ;;  %v2381_v60 = vrot.slane %v1819_v56, %v1670_v7  ;;  %v925_v41 = vpop.permute.xlu0 %924 }
 0x179   :  { %v609_v59 = vmul.f32 %v2377_v47, %v424_v28  ;;  %v917_v0 = vmul.f32 %v2378_v63, %v904_v27  ;;  %v439_v14 = vadd.f32 %v437_v42, %v417_v24  ;;  %v440_v20 = vadd.f32 %v438_v35, %v418_v10 }
 0x17a   :  { %v918_v13 = vmul.f32 %v2379_v3, %v904_v27  ;;  %v1088_v18 = vmul.f32 %v2380_v44, %v904_v27  ;;  %v1089_v11 = vmul.f32 %v2381_v60, %v904_v27  ;;  %v610_v50 = vadd.f32 %v608_v46, %v593_v31 }
 0x17b   :  { %v611_v30 = vadd.f32 %v609_v59, %v594_v48  ;;  %v919_v21 = vadd.f32 %v917_v0, %v898_v29  ;;  %v2382_v51 = vrot.slane %v1824_v57, %v1668_v5  ;;  %v2383_v39 = vrot.slane %v1824_v57, %v1670_v7 }
 0x17c   :  { %v920_v25 = vadd.f32 %v918_v13, %v899_v33  ;;  %v1090_v37 = vadd.f32 %v1088_v18, %v1073_v34  ;;  %v1091_v40 = vadd.f32 %v1089_v11, %v1074_v43  ;;  %v2384_v56 = vrot.slane %v1837_v62, %v1668_v5  ;;  %v468_v34 = vpop.permute.xlu1 %467  ;;  %v946_v12 = vpop.permute.xlu0 %945 }
 0x17d   :  { %v459_v1 = vmul.f32 %v2382_v51, %v446_v15  ;;  %v460_v45 = vmul.f32 %v2383_v39, %v446_v15  ;;  %v2385_v4 = vrot.slane %v1837_v62, %v1670_v7  ;;  %v2386_v17 = vrot.slane %v1852_v36, %v1668_v5 }
 0x17e   :  { %v625_v16 = vmul.f32 %v2384_v56, %v446_v15  ;;  %v2387_v9 = vrot.slane %v1852_v36, %v1670_v7  ;;  %v2388_v57 = vrot.slane %v1865_v6, %v1668_v5  ;;  %v2389_v31 = vrot.slane %v1865_v6, %v1670_v7 }
 0x17f   :  { %v626_v26 = vmul.f32 %v2385_v4, %v446_v15  ;;  %v938_v23 = vmul.f32 %v2386_v17, %v925_v41  ;;  %v461_v28 = vadd.f32 %v459_v1, %v439_v14  ;;  %v462_v29 = vadd.f32 %v460_v45, %v440_v20 }
 0x180   :  { %v939_v24 = vmul.f32 %v2387_v9, %v925_v41  ;;  %v1105_v10 = vmul.f32 %v2388_v57, %v925_v41  ;;  %v1106_v48 = vmul.f32 %v2389_v31, %v925_v41  ;;  %v627_v62 = vadd.f32 %v625_v16, %v610_v50 }
 0x181   :  { %v628_v33 = vadd.f32 %v626_v26, %v611_v30  ;;  %v940_v43 = vadd.f32 %v938_v23, %v919_v21  ;;  %v2390_v36 = vrot.slane %v1870_v19, %v1668_v5  ;;  %v2391_v38 = vrot.slane %v1870_v19, %v1670_v7  ;;  %v490_v30 = vpop.permute.xlu1 %489 }
 0x182   :  { %v941_v27 = vadd.f32 %v939_v24, %v920_v25  ;;  %v1107_v32 = vadd.f32 %v1105_v10, %v1090_v37  ;;  %v1108_v42 = vadd.f32 %v1106_v48, %v1091_v40  ;;  %v2392_v6 = vrot.slane %v1883_v2, %v1668_v5 }
 0x183   :  { %v481_v35 = vmul.f32 %v2390_v36, %v468_v34  ;;  %v482_v46 = vmul.f32 %v2391_v38, %v468_v34  ;;  %v2393_v59 = vrot.slane %v1883_v2, %v1670_v7  ;;  %v2394_v0 = vrot.slane %v1888_v61, %v1668_v5 }
 0x184   :  { %v642_v47 = vmul.f32 %v2392_v6, %v468_v34  ;;  %v2395_v13 = vrot.slane %v1888_v61, %v1670_v7  ;;  %v2396_v19 = vrot.slane %v1903_v58, %v1668_v5  ;;  %v2397_v60 = vrot.slane %v1903_v58, %v1670_v7  ;;  %v967_v61 = vpop.permute.xlu0 %966  ;;  %v2413_v6 = vld [vmem:[#allocation8_spill] sm:$0xff] }
 0x185   :  { %v643_v63 = vmul.f32 %v2393_v59, %v468_v34  ;;  %v959_v3 = vmul.f32 %v2394_v0, %v946_v12  ;;  %v483_v14 = vadd.f32 %v481_v35, %v461_v28  ;;  %v484_v2 = vadd.f32 %v482_v46, %v462_v29  ;;  %v2410_v35 = vld [vmem:[#allocation7_spill] sm:$0xff] }
 0x186   :  { %v960_v44 = vmul.f32 %v2395_v13, %v946_v12  ;;  %v1122_v18 = vmul.f32 %v2396_v19, %v946_v12  ;;  %v1123_v11 = vmul.f32 %v2397_v60, %v946_v12  ;;  %v644_v20 = vadd.f32 %v642_v47, %v627_v62 }
 0x187   :  { %v645_v50 = vadd.f32 %v643_v63, %v628_v33  ;;  %v961_v15 = vadd.f32 %v959_v3, %v940_v43  ;;  %v2398_v40 = vrot.slane %v1908_v55, %v1668_v5  ;;  %v2399_v51 = vrot.slane %v1908_v55, %v1670_v7  ;;  %v988_v43 = vpop.permute.xlu1 %987  ;;  %v2416_v3 = vld [vmem:[#allocation9_spill] sm:$0xff] }
 0x188   :  { %v962_v21 = vadd.f32 %v960_v44, %v941_v27  ;;  %v1124_v25 = vadd.f32 %v1122_v18, %v1107_v32  ;;  %v1125_v37 = vadd.f32 %v1123_v11, %v1108_v42  ;;  %v2400_v1 = vrot.slane %v1921_v54, %v1668_v5  ;;  %v1009_v34 = vpop.permute.xlu0 %1008 }
 0x189   :  { %v503_v41 = vmul.f32 %v2398_v40, %v490_v30  ;;  %v504_v58 = vmul.f32 %v2399_v51, %v490_v30  ;;  %v2401_v45 = vrot.slane %v1921_v54, %v1670_v7  ;;  %v2402_v16 = vrot.slane %v1926_v53, %v1668_v5 }
 0x18a   :  { %v659_v39 = vmul.f32 %v2400_v1, %v490_v30  ;;  %v2403_v26 = vrot.slane %v1926_v53, %v1670_v7  ;;  %v2404_v55 = vrot.slane %v1939_v52, %v1668_v5  ;;  %v2405_v9 = vrot.slane %v1939_v52, %v1670_v7 }
 0x18b   :  { %v660_v56 = vmul.f32 %v2401_v45, %v490_v30  ;;  %v980_v4 = vmul.f32 %v2402_v16, %v967_v61  ;;  %v505_v57 = vadd.f32 %v503_v41, %v483_v14  ;;  %v506_v10 = vadd.f32 %v504_v58, %v484_v2 }
 0x18c   :  { %v981_v17 = vmul.f32 %v2403_v26, %v967_v61  ;;  %v1139_v23 = vmul.f32 %v2404_v55, %v967_v61  ;;  %v1140_v24 = vmul.f32 %v2405_v9, %v967_v61  ;;  %v661_v54 = vadd.f32 %v659_v39, %v644_v20  ;;  %v246_v20 = vpop.permute.xlu1 %245  ;;  %v2421_v55 = vld [vmem:[#allocation3_spill] sm:$0xff]  ;;  %v2422_v9 = vld [vmem:[#allocation2_spill] sm:$0xff] }
 0x18d   :  { %v662_v31 = vadd.f32 %v660_v56, %v645_v50  ;;  %v2406_v48 = vrot.slane %v1675_v8, %v1668_v5  ;;  %v2407_v53 = vrot.slane %v1675_v8, %v1670_v7  ;;  %v982_v62 = vadd.f32 %v980_v4, %v961_v15  ;;  %v2418_v50 = vld [vmem:[#allocation6_spill] sm:$0xff]  ;;  %1478 = vpush %v246_v20 }
 0x18e   :  { %v983_v33 = vadd.f32 %v981_v17, %v962_v21  ;;  %v1141_v52 = vadd.f32 %v1139_v23, %v1124_v25  ;;  %v1142_v27 = vadd.f32 %v1140_v24, %v1125_v37  ;;  %v2408_v32 = vrot.slane %v1944_v49, %v1668_v5 }
 0x18f   :  { %v676_v28 = vmul.f32 %v2406_v48, %v1890_v22  ;;  %v677_v29 = vmul.f32 %v2407_v53, %v1890_v22  ;;  %v2409_v12 = vrot.slane %v1944_v49, %v1670_v7  ;;  %v2411_v38 = vrot.slane %v2410_v35, %v1668_v5  ;;  %v2417_v49 = vld [vmem:[#allocation10_spill] sm:$0xff]  ;;  %v2426_v53 = vld [vmem:[#allocation5_spill] sm:$0xff] }
 0x190   :  { %v1022_v42 = vmul.f32 %v2408_v32, %v1009_v34  ;;  %v2412_v8 = vrot.slane %v2410_v35, %v1670_v7  ;;  %v2414_v47 = vrot.slane %v2413_v6, %v1668_v5  ;;  %v2415_v63 = vrot.slane %v2413_v6, %v1670_v7 }
 0x191   :  { %v1023_v36 = vmul.f32 %v2409_v12, %v1009_v34  ;;  %v1001_v46 = vmul.f32 %v2411_v38, %v988_v43  ;;  %v527_v13 = vadd.f32 %v2416_v3, %v505_v57  ;;  %v528_v44 = vadd.f32 %v2417_v49, %v506_v10  ;;  %v2254_v57 = vld [vmem:[%s2326_s0 + $0x68] sm:$0xf]  ;;  %v2423_v10 = vld [vmem:[#allocation4_spill] sm:$0xff] }
 0x192   :  { %v1002_v22 = vmul.f32 %v2412_v8, %v988_v43  ;;  %v1156_v59 = vmul.f32 %v2414_v47, %v988_v43  ;;  %v1157_v0 = vmul.f32 %v2415_v63, %v988_v43  ;;  %v678_v19 = vadd.f32 %v676_v28, %v661_v54 }
 0x193   :  { %v679_v18 = vadd.f32 %v677_v29, %v662_v31  ;;  %v1003_v60 = vadd.f32 %v1001_v46, %v982_v62  ;;  %v2419_v30 = vrot.slane %v2418_v50, %v1668_v5  ;;  %v2420_v21 = vrot.slane %v2418_v50, %v1670_v7 }
 0x194   :  { %v1004_v11 = vadd.f32 %v1002_v22, %v983_v33  ;;  %v1158_v14 = vadd.f32 %v1156_v59, %v1141_v52  ;;  %v1159_v2 = vadd.f32 %v1157_v0, %v1142_v27  ;;  %v2224_v37 = vsel %vm680_vm12, %v527_v13, %v678_v19  ;;  %v706_v52 = vpop.permute.xlu1 %705 }
 0x195   :  { %v1173_v15 = vmul.f32 %v2419_v30, %v1009_v34  ;;  %v1174_v25 = vmul.f32 %v2420_v21, %v1009_v34  ;;  %v2227_v61 = vsel %vm680_vm12, %v528_v44, %v679_v18  ;;  %v688_v41 = vmul.f32 %v2224_v37, %v2224_v37 }
 0x196   :  { %v683_v40 = vadd.f32 %v2227_v61, %v2224_v37  ;;  %v689_v5 = vmul.f32 %v2227_v61, %v2227_v61  ;;  %v1024_v51 = vadd.f32 %v1022_v42, %v1003_v60  ;;  %v1025_v58 = vadd.f32 %v1023_v36, %v1004_v11 }
 0x197   :  { %v1175_v7 = vadd.f32 %v1173_v15, %v1158_v14  ;;  %v1176_v1 = vadd.f32 %v1174_v25, %v1159_v2  ;;  %v228_v23 = vmul.f32 0.1, %v2421_v55  ;;  %vm216_vm13 = vcmp.gt.f32.partialorder %v2421_v55, 0.0 }
 0x198   :  { %684 = vadd.xlane.f32.xlu0 %v683_v40  ;;  %v690_v39 = vadd.f32 %v689_v5, %v688_v41  ;;  %v229_v54 = vmul.f32 0.1, %v2423_v10  ;;  %vm217_vm14 = vcmp.gt.f32.partialorder %v2423_v10, 0.0  ;;  %v2424_v31 = vmov 0  }
 0x199   :  { %v2236_v45 = vsel %vm680_vm12, %v1024_v51, %v1175_v7  ;;  %v2239_v56 = vsel %vm680_vm12, %v1025_v58, %v1176_v1  ;;  %v240_v24 = vsel %vm216_vm13, %v2421_v55, %v228_v23  ;;  %v2425_v28 = vmov 1  }
 0x19a   :  { %691 = vadd.xlane.f32.xlu1 %v690_v39  ;;  %v1179_v16 = vadd.f32 %v2239_v56, %v2236_v45  ;;  %v1183_v4 = vmul.f32 %v2236_v45, %v2236_v45  ;;  %v1184_v26 = vmul.f32 %v2239_v56, %v2239_v56  ;;  %v2261_v48 = vsel %vm217_vm14, %v2423_v10, %v229_v54 }
 0x19b   :  { %v243_v29 = vmin.f32 %v2426_v53, 0.0  ;;  %v242_v62 = vmax.f32 %v2426_v53, 0.0  ;;  %v2427_v19 = vmov 0.0  }
 0x19c   :  { %1180 = vadd.xlane.f32.xlu0 %v1179_v16  ;;  %v1185_v17 = vadd.f32 %v1184_v26, %v1183_v4 }
 0x1a0   :  { %1186 = vadd.xlane.f32.xlu0 %v1185_v17 }
 0x1ab   :  { %1199 = vperm.xlu1 %1497, %v2422_v9  }
 0x1af   :  { %1205 = vperm.xlu1 %1497, %v240_v24  }
 0x1b3   :  { %253 = vrot.lane.b32.xlu1 %v2254_v57, %s1520_s17 }
 0x1b4   :  { %1498 = vset.pattern.permute.xlu1 %v2424_v31 }
 0x1b6   :  { %712 = vperm.xlu0 %1496, %v240_v24  }
 0x1b7   :  { %817 = vperm.xlu1 %1498, %v2261_v48  }
 0x1ba   :  { %1500 = vset.pattern.permute.xlu0 %v2425_v28 }
 0x1bb   :  { %1499 = vset.pattern.permute.xlu1 %v2425_v28 }
 0x1be   :  { %s1479_s0 = spop %1478 }
 0x1bf   :  { %v248_v33 = vstv %s1479_s0 }
 0x1c0   :  { %v250_v34 = vmul.f32 %v248_v33, %v243_v29 }
 0x1c2   :  { %v251_v43 = vadd.f32 %v250_v34, %v242_v62 }
 0x1c4   :  { %1464 = vmatpush3.msra.mxu1 %v251_v43 }
 0x225   :  { %v685_v27 = vpop.xlane.xlu0 %684 }
 0x226   :  { %v687_v32 = vmul.f32 0.00390625, %v685_v27 }
 0x227   :  { %v692_v42 = vpop.xlane.xlu1 %691 }
 0x228   :  { %v694_v12 = vmul.f32 %v687_v32, %v687_v32  ;;  %v693_v36 = vmul.f32 0.00390625, %v692_v42  ;;  %v697_v18 = vsub.f32 %v2224_v37, %v687_v32  ;;  %v698_v60 = vsub.f32 %v2227_v61, %v687_v32 }
 0x229   :  { %v1181_v35 = vpop.xlane.xlu0 %1180 }
 0x22a   :  { %v695_v38 = vsub.f32 %v693_v36, %v694_v12  ;;  %v1182_v46 = vmul.f32 0.00390625, %v1181_v35 }
 0x22b   :  { %v1200_v8 = vpop.permute.xlu1 %1199 }
 0x22c   :  { %v696_v22 = vmax.f32 %v695_v38, 0.0  ;;  %v1189_v59 = vmul.f32 %v1182_v46, %v1182_v46  ;;  %v1192_v15 = vsub.f32 %v2236_v45, %v1182_v46  ;;  %v1193_v21 = vsub.f32 %v2239_v56, %v1182_v46 }
 0x22d   :  { %v1187_v6 = vpop.xlane.xlu0 %1186 }
 0x22e   :  { %v699_v47 = vadd.f32 1e-05, %v696_v22  ;;  %v1188_v63 = vmul.f32 0.00390625, %v1187_v6 }
 0x22f   :  { %v1206_v0 = vpop.permute.xlu1 %1205 }
 0x230   :  { %1502 = vrsqrt.f32 %v699_v47  ;;  %v1190_v3 = vsub.f32 %v1188_v63, %v1189_v59 }
 0x232   :  { %v1191_v13 = vmax.f32 %v1190_v3, 0.0 }
 0x233   :  { %v254_v49 = vpop.permute.xlu1 %253 }
 0x234   :  { %v1194_v44 = vadd.f32 1e-05, %v1191_v13  ;;  %1466 = vmatmul.mubr.msk.f32.vlgmr.msra.gmra.mrb[10].mxu1 %vm255_vm15, %v254_v49 }
 0x235   :  { %785 = vmatprep.mubr.f32.mxu1 %v2427_v19  ;;  %v713_v30 = vpop.permute.xlu0 %712 }
 0x236   :  { %1504 = vrsqrt.f32 %v1194_v44 }
 0x237   :  { %v818_v13 = vpop.permute.xlu1 %817 }
 0x23a   :  { %v1503_v11 = vpop.eup %1502 }
 0x23b   :  { %v701_v14 = vmul.f32 %v1503_v11, %v697_v18  ;;  %v702_v2 = vmul.f32 %v1503_v11, %v698_v60 }
 0x23d   :  { %v708_v20 = vmul.f32 %v706_v52, %v701_v14  ;;  %v709_v50 = vmul.f32 %v706_v52, %v702_v2 }
 0x23f   :  { %v715_v25 = vadd.f32 %v713_v30, %v708_v20  ;;  %v716_v40 = vadd.f32 %v713_v30, %v709_v50 }
 0x240   :  { %v1505_v41 = vpop.eup %1504 }
 0x241   :  { %v1196_v5 = vmul.f32 %v1505_v41, %v1192_v15  ;;  %v1197_v51 = vmul.f32 %v1505_v41, %v1193_v21  ;;  %v717_v58 = vmax.f32 %v715_v25, 0.0  ;;  %v718_v7 = vmax.f32 %v716_v40, 0.0 }
 0x243   :  { %v1202_v37 = vmul.f32 %v1200_v8, %v1196_v5  ;;  %v1203_v1 = vmul.f32 %v1200_v8, %v1197_v51  ;;  %721 = vmatprep.subr.mxu1 %v718_v7 }
 0x244   :  { %722 = vmatpush1.msra.mxu1 %v717_v58 }
 0x245   :  { %v1208_v61 = vadd.f32 %v1206_v0, %v1202_v37  ;;  %v1209_v39 = vadd.f32 %v1206_v0, %v1203_v1  ;;  %1377 = vmatmul.mubr.msk.f32.vlgmr.msra.gmra.mrb[12].mxu1 %vm255_vm15, %v2254_v57 }
 0x246   :  { %1276 = vmatprep.mubr.f32.mxu1 %v2427_v19 }
 0x247   :  { %v1210_v45 = vmax.f32 %v1208_v61, 0.0  ;;  %v1211_v56 = vmax.f32 %v1209_v39, 0.0 }
 0x249   :  { %1212 = vmatprep.subr.mxu1 %v1211_v56 }
 0x24a   :  { %1213 = vmatpush1.msra.mxu1 %v1210_v45 }
 0x24b   :  { %1396 = vmatmul.mubr.msk.f32.vlgmr.msra.gmra.mrb[14].mxu1 %vm255_vm15, %v2254_v57 }
 0x307   :  { %v324_v16 = vpop.f32.mrb[10].mxu1 }
 0x308   :  { %v1359_v4 = vmul.f32 -1.442695, %v324_v16  ;;  %v1467_v26 = vpop.f32.mrb[11].mxu1 }
 0x30a   :  { %1506 = vpow2.f32 %v1359_v4 }
 0x314   :  { %v1507_v17 = vpop.eup %1506 }
 0x315   :  { %v331_v55 = vadd.f32 1.0, %v1507_v17 }
 0x317   :  { %1508 = vrcp.f32 %v331_v55 }
 0x318   :  { %v2279_v23 = vpop.f32.mrb[12].mxu1 }
 0x319   :  { %v798_v9 = vmul.f32 %v2279_v23, %v2279_v23  ;;  %v2283_v24 = vpop.f32.mrb[13].mxu1  ;;  %v792_v10 = vsel %vm680_vm12, %v2279_v23, 0.0 }
 0x31a   :  { %v799_v57 = vmul.f32 %v2283_v24, %v2283_v24  ;;  %v793_v54 = vsel %vm680_vm12, %v2283_v24, 0.0 }
 0x31b   :  { %v800_v28 = vsel %vm680_vm12, %v798_v9, 0.0  ;;  %v794_v53 = vadd.f32 %v793_v54, %v792_v10  ;;  %v827_v54 = vld [vmem:[%s2328_s3 + $0x8] sm:$0xf] }
 0x31c   :  { %v801_v29 = vsel %vm680_vm12, %v799_v57, 0.0  ;;  %v826_v57 = vld [vmem:[%s2328_s3] sm:$0xf] }
 0x31d   :  { %v802_v62 = vadd.f32 %v801_v29, %v800_v28 }
 0x31e   :  { %v1278_v33 = vpop.f32.mrb[14].mxu1 }
 0x31f   :  { %v1289_v34 = vmul.f32 %v1278_v33, %v1278_v33  ;;  %v1280_v43 = vpop.f32.mrb[15].mxu1  ;;  %803 = vadd.xlane.f32.xlu0 %v802_v62  ;;  %v1283_v52 = vsel %vm680_vm12, %v1278_v33, 0.0 }
 0x320   :  { %v1284_v27 = vsel %vm680_vm12, %v1280_v43, 0.0  ;;  %v1290_v32 = vmul.f32 %v1280_v43, %v1280_v43 }
 0x321   :  { %v1509_v42 = vpop.eup %1508  ;;  %v1285_v12 = vadd.f32 %v1284_v27, %v1283_v52  ;;  %v1291_v36 = vsel %vm680_vm12, %v1289_v34, 0.0 }
 0x322   :  { %1319 = vperm.xlu1 %1499, %v1509_v42   ;;  %v1292_v35 = vsel %vm680_vm12, %v1290_v32, 0.0 }
 0x323   :  { %1286 = vadd.xlane.f32.xlu0 %v1285_v12  ;;  %v1293_v38 = vadd.f32 %v1292_v35, %v1291_v36 }
 0x326   :  { %1501 = vset.pattern.permute.xlu1 %v2424_v31  ;;  %v1316_v31 = vld [vmem:[%s2328_s3] sm:$0xf0] }
 0x327   :  { %1294 = vadd.xlane.f32.xlu0 %v1293_v38 }
 0x33d   :  { %1307 = vperm.xlu0 %1500, %v2261_v48   ;;  %v1317_v48 = vld [vmem:[%s2328_s3 + $0x8] sm:$0xf0] }
 0x346   :  { %795 = vadd.xlane.f32.xlu1 %v794_v53  ;;  %v822_v53 = vrot.slane %v818_v13, 4 }
 0x357   :  { %830 = vperm.xlu1 %1501, %v1509_v42  }
 0x3a1   :  { %v1320_v49 = vpop.permute.xlu1 %1319 }
 0x3a2   :  { %v1321_v44 = vrot.slane %v1320_v49, 4 }
 0x3a4   :  { %v1323_v14 = vmul.f32 %v1321_v44, %v1316_v31  ;;  %v1324_v2 = vmul.f32 %v1321_v44, %v1317_v48 }
 0x3a6   :  { %v1327_v25 = vrot.slane %v1323_v14, 4  ;;  %v1328_v40 = vrot.slane %v1324_v2, 4 }
 0x3ac   :  { %v804_v46 = vpop.xlane.xlu0 %803 }
 0x3ad   :  { %v805_v39 = vmul.f32 0.00390625, %v804_v46 }
 0x3b0   :  { %v1287_v8 = vpop.xlane.xlu0 %1286 }
 0x3b1   :  { %v1288_v22 = vmul.f32 0.00390625, %v1287_v8 }
 0x3b3   :  { %v1297_v6 = vmul.f32 %v1288_v22, %v1288_v22  ;;  %v1300_v19 = vsub.f32 %v1278_v33, %v1288_v22  ;;  %v1301_v18 = vsub.f32 %v1280_v43, %v1288_v22 }
 0x3b4   :  { %v1295_v47 = vpop.xlane.xlu0 %1294 }
 0x3b5   :  { %v1296_v59 = vmul.f32 0.00390625, %v1295_v47 }
 0x3b7   :  { %v1298_v63 = vsub.f32 %v1296_v59, %v1297_v6 }
 0x3b9   :  { %v1299_v0 = vmax.f32 %v1298_v63, 0.0 }
 0x3bb   :  { %v1302_v3 = vadd.f32 1e-05, %v1299_v0 }
 0x3bc   :  { %v1308_v11 = vpop.permute.xlu0 %1307 }
 0x3bd   :  { %1510 = vrsqrt.f32 %v1302_v3  ;;  %v1312_v21 = vrot.slane %v1308_v11, 4 }
 0x3c7   :  { %v1511_v60 = vpop.eup %1510 }
 0x3c8   :  { %v1304_v20 = vmul.f32 %v1511_v60, %v1300_v19  ;;  %v1305_v50 = vmul.f32 %v1511_v60, %v1301_v18 }
 0x3ca   :  { %v1310_v30 = vmul.f32 %v1308_v11, %v1304_v20  ;;  %v1311_v15 = vmul.f32 %v1308_v11, %v1305_v50 }
 0x3cc   :  { %v1314_v41 = vadd.f32 %v1312_v21, %v1310_v30  ;;  %v1315_v5 = vadd.f32 %v1312_v21, %v1311_v15 }
 0x3ce   :  { %v1331_v51 = vadd.f32 %v1327_v25, %v1314_v41  ;;  %v1332_v58 = vadd.f32 %v1328_v40, %v1315_v5 }
 0x3d0   :  { %v1335_v7 = vrot.slane %v1331_v51, 4  ;;  %v1336_v37 = vrot.slane %v1332_v58, 4 }
 0x3d2   :  { %1339 = vst [vmem:[%s2329_s4] sm:$0xf0] %v1335_v7  ;;  %1340 = vst [vmem:[%s2329_s4 + $0x8] sm:$0xf0] %v1336_v37 }
 0x3d3   :  { %v796_v1 = vpop.xlane.xlu1 %795 }
 0x3d4   :  { %v797_v61 = vmul.f32 0.00390625, %v796_v1 }
 0x3d6   :  { %v806_v45 = vmul.f32 %v797_v61, %v797_v61  ;;  %v809_v26 = vsub.f32 %v2279_v23, %v797_v61  ;;  %v810_v17 = vsub.f32 %v2283_v24, %v797_v61 }
 0x3d7   :  { %v831_v28 = vpop.permute.xlu1 %830 }
 0x3d8   :  { %v807_v56 = vsub.f32 %v805_v39, %v806_v45  ;;  %v833_v23 = vmul.f32 %v831_v28, %v826_v57  ;;  %v834_v43 = vmul.f32 %v831_v28, %v827_v54 }
 0x3da   :  { %v808_v16 = vmax.f32 %v807_v56, 0.0 }
 0x3dc   :  { %v811_v4 = vadd.f32 1e-05, %v808_v16 }
 0x3de   :  { %1512 = vrsqrt.f32 %v811_v4 }
 0x3e8   :  { %v1513_v55 = vpop.eup %1512 }
 0x3e9   :  { %v813_v9 = vmul.f32 %v1513_v55, %v809_v26  ;;  %v814_v10 = vmul.f32 %v1513_v55, %v810_v17 }
 0x3eb   :  { %v820_v29 = vmul.f32 %v818_v13, %v813_v9  ;;  %v821_v62 = vmul.f32 %v818_v13, %v814_v10 }
 0x3ed   :  { %v824_v33 = vadd.f32 %v822_v53, %v820_v29  ;;  %v825_v34 = vadd.f32 %v822_v53, %v821_v62 }
 0x3ef   :  { %v835_v24 = vadd.f32 %v833_v23, %v824_v33  ;;  %v836_v52 = vadd.f32 %v834_v43, %v825_v34 }
 0x3f1   :  { %837 = vst [vmem:[%s2329_s4] sm:$0xf] %v835_v24  ;;  %838 = vst [vmem:[%s2329_s4 + $0x8] sm:$0xf] %v836_v52 }

</bundles_post_ra>
